<compile_context>
chip_gen: v6e
topology: v6e:2x2x1
jax: 0.10.0
libtpu: 0.0.40
codegen_flags: <defaults>
</compile_context>

<pallas_src>
import functools

import jax
import jax.numpy as jnp
import numpy as np
from jax import lax
from jax.experimental import pallas as pl
from jax.experimental.pallas import tpu as pltpu


# ---------------------------------------------------------------------------
# The single fused Pallas kernel
# ---------------------------------------------------------------------------

def _convnet_kernel(x_ref, m1_ref, bias_ref, m2_hbm, w3_hbm, w4_hbm, out_ref,
                    m2_v, w3_v, w4_v, sem, *, hp1, c1, c2):
    """Entire ConvNet forward on VMEM-resident slabs.

    Activation layout everywhere: rows = batch * spatial_row with batch b
    anchored at row b*hp1 (row count is fixed at B*hp1 for every stage),
    lanes = spatial_col * channels.  Each conv / fc layer is exactly ONE
    MXU matmul against a prepacked banded weight slab.
    """
    f32 = jnp.float32
    bf16 = jnp.bfloat16

    # Prefetch the late-layer weights (conv2 / fc1 / fc2, ~0.6 MB) so their
    # HBM DMA overlaps conv1+pool1 compute instead of the kernel prologue.
    cp_m2 = pltpu.make_async_copy(m2_hbm, m2_v, sem.at[0])
    cp_w3 = pltpu.make_async_copy(w3_hbm, w3_v, sem.at[1])
    cp_w4 = pltpu.make_async_copy(w4_hbm, w4_v, sem.at[2])
    cp_m2.start()
    cp_w3.start()
    cp_w4.start()

    def rows(x, d):
        """Row-shifted copy: result[r] = x[r + d], zero-filled out of range."""
        n, w = x.shape
        if d == 0:
            return x
        if d > 0:
            return jnp.concatenate([x[d:], jnp.zeros((d, w), x.dtype)], axis=0)
        return jnp.concatenate([jnp.zeros((-d, w), x.dtype), x[:n + d]], axis=0)

    def banded(x, shifts):
        """Lane-concat of row-shifted copies -> one fused-K matmul input."""
        return jnp.concatenate([rows(x, d) for d in shifts], axis=1)

    def wpool(x, blk):
        """2x max-pool along the width axis packed in lanes (blk = #channels).

        Lane slices at 32/64-lane offsets ride in otherwise-idle VPU/XLU
        slots; they are off the MXU critical path.
        """
        npair = x.shape[1] // (2 * blk)
        return jnp.concatenate(
            [jnp.maximum(x[:, (2 * p) * blk:(2 * p + 1) * blk],
                         x[:, (2 * p + 1) * blk:(2 * p + 2) * blk])
             for p in range(npair)], axis=1)

    # ---- conv1 + bias + ReLU: ONE matmul (all 5 kernel rows fused into K) --
    xin = x_ref[...]                                    # (B*16, 16*Cin) bf16
    k1 = m1_ref.shape[0] // xin.shape[1]
    x1 = banded(xin, list(range(k1)))                   # (B*16, k1*16*Cin)
    a1 = jnp.dot(x1, m1_ref[...], preferred_element_type=f32)
    a1 = jnp.maximum(a1 + bias_ref[0:1, 0:a1.shape[1]], 0.0)   # (B*16, 12*32)

    # ---- maxpool1 (2x2) in f32: valid pooled rows land at even row offsets --
    pw1 = a1.shape[1] // c1 // 2
    p1 = wpool(jnp.maximum(a1, rows(a1, 1)), c1)        # (B*16, 6*32) f32
    # Zero the per-batch row offsets >= 2*pw1: they double as conv2's zero
    # h-padding rows and as the cross-batch garbage barrier.
    ridx = lax.broadcasted_iota(jnp.int32, p1.shape, 0)
    p1 = jnp.where(ridx % hp1 < 2 * pw1, p1, 0.0).astype(bf16)

    # ---- conv2 + bias + ReLU: ONE matmul; row stride 2 = pool1 decimation ---
    k2 = m2_v.shape[0] // p1.shape[1]
    x2 = banded(p1, [2 * (kh - 1) for kh in range(k2)])  # (B*16, 3*6*32) bf16
    cp_m2.wait()
    a2 = jnp.dot(x2, m2_v[...], preferred_element_type=f32)
    a2 = jnp.maximum(a2 + bias_ref[1:2, 0:a2.shape[1]], 0.0)   # (B*16, 6*64)

    # ---- maxpool2 (2x2) in f32: valid pooled rows at row offsets 0/4/8 ------
    p2 = wpool(jnp.maximum(a2, rows(a2, 2)), c2).astype(bf16)  # (B*16, 3*64)

    # ---- fc1 + ReLU: ONE matmul; the PyTorch NCHW flatten permutation is
    #      folded into w3; row stride 4 = two 2x pool decimations.
    nhb = w3_v.shape[0] // p2.shape[1]
    x3 = banded(p2, [4 * h for h in range(nhb)])        # (B*16, 3*3*64) bf16
    cp_w3.wait()
    hid = jnp.dot(x3, w3_v[...], preferred_element_type=f32)
    hid = jnp.maximum(hid + bias_ref[2:3, 0:hid.shape[1]], 0.0)  # (B*16, 128)

    # ---- fc2 (lane-dense 128-wide logits; valid rows/classes sliced outside)
    cp_w4.wait()
    out = jnp.dot(hid.astype(bf16), w4_v[...], preferred_element_type=f32)
    out_ref[...] = out + bias_ref[3:4, 0:out.shape[1]]


# ---------------------------------------------------------------------------
# One-time parameter preparation (all repacking hoisted out of the forward)
# ---------------------------------------------------------------------------

def prepare_params(params):
    """Repack PyTorch-layout weights into prelowered banded slabs (host-side,
    runs once).  Batch-size independent."""
    w1, b1, w2, b2, wfc1, bfc1, wfc2, bfc2 = [
        np.asarray(jax.device_get(p), np.float32) for p in params]
    C1, Cin, K1, _ = w1.shape            # (32, Cin, 5, 5)
    C2, _, K2, _ = w2.shape              # (64, 32, 3, 3)
    NH, NE = wfc1.shape                  # (100, 576)
    NC = wfc2.shape[0]                   # 10
    H = 14                               # the module is defined for 14x14 input
    HP1 = H + 2                          # conv1 padded height/width (16)
    OW1 = HP1 - K1 + 1                   # conv1 output width (12)
    PW1 = OW1 // 2                       # pool1 output width (6)
    HP2 = PW1 + 2                        # conv2 padded height/width (8)
    OW2 = HP2 - K2 + 1                   # conv2 output width (6)
    PH2 = OW2 // 2                       # pool2 output height/width (3)
    assert NE == C2 * PH2 * PH2
    NHP = ((NH + 127) // 128) * 128      # lane-dense hidden width (128)
    NCP = ((NC + 127) // 128) * 128      # lane-dense logits width (128)

    # conv1 -> one banded slab: rows (kh, wp, ci), cols (ow, co).
    m1 = np.zeros((K1, HP1, Cin, OW1, C1), np.float32)
    for kh in range(K1):
        for ow in range(OW1):
            for kw in range(K1):
                m1[kh, ow + kw, :, ow, :] = w1[:, :, kh, kw].T
    m1 = m1.reshape(K1 * HP1 * Cin, OW1 * C1)

    # conv2 -> one banded slab over the width-COMPACTED pooled1 layout
    # (structurally-zero K rows pruned: K = 3*6*32 = 576, not 1056); the
    # width zero-padding columns contribute nothing and are simply absent.
    m2 = np.zeros((K2, PW1, C1, OW2, C2), np.float32)
    for kh in range(K2):
        for ow in range(OW2):
            for kw in range(K2):
                wp = ow + kw             # padded width coordinate in [0, 8)
                if 1 <= wp <= PW1:
                    m2[kh, wp - 1, :, ow, :] = w2[:, :, kh, kw].T
    m2 = m2.reshape(K2 * PW1 * C1, OW2 * C2)

    # fc1: fold the PyTorch NCHW .view(B,-1) flatten permutation into the
    # weights; rows ordered (h, w, c) to match the kernel's pooled2 layout.
    w3 = np.zeros((PH2 * PH2 * C2, NHP), np.float32)
    w3[:, :NH] = np.transpose(
        wfc1.reshape(NH, C2, PH2, PH2), (2, 3, 1, 0)).reshape(-1, NH)

    w4 = np.zeros((NHP, NCP), np.float32)
    w4[:NH, :NC] = wfc2.T

    # All four biases packed into one small f32 array (fewer prologue DMAs).
    bw = max(OW1 * C1, OW2 * C2, NHP, NCP)
    bias = np.zeros((4, bw), np.float32)
    bias[0, :OW1 * C1] = np.tile(b1, OW1)
    bias[1, :OW2 * C2] = np.tile(b2, OW2)
    bias[2, :NH] = bfc1
    bias[3, :NC] = bfc2

    bf = jnp.bfloat16
    weights = dict(
        m1=jnp.asarray(m1, bf), m2=jnp.asarray(m2, bf),
        w3=jnp.asarray(w3, bf), w4=jnp.asarray(w4, bf),
        bias=jnp.asarray(bias, jnp.float32),
    )
    cfg = (int(C1), int(C2), int(HP1), int(NC))   # static ints
    return weights, cfg


# ---------------------------------------------------------------------------
# Forward pass: minimal XLA glue + one pallas_call
# ---------------------------------------------------------------------------

def convnet_forward(x_nchw, weights, *, cfg):
    c1, c2, hp1, n_classes = cfg
    B, Cin, H, W = x_nchw.shape
    if H + 2 != hp1 or W + 2 != hp1:
        raise ValueError(f"expected {hp1 - 2}x{hp1 - 2} input, got {H}x{W}")

    # NCHW -> padded NHWC -> "image rows x (width*channels)" slab, bf16 (MXU).
    xin = jnp.transpose(x_nchw, (0, 2, 3, 1))
    xin = jnp.pad(xin, ((0, 0), (1, 1), (1, 1), (0, 0)))
    xin = xin.reshape(B * hp1, hp1 * Cin).astype(jnp.bfloat16)
    nr = B * hp1

    m1, m2, w3, w4, bias = (weights[k] for k in ("m1", "m2", "w3", "w4", "bias"))
    if m1.shape[0] != (m1.shape[1] // c1 + hp1 - 1) // 1 * 0 + m1.shape[0]:
        pass  # shapes are validated implicitly by the matmuls below

    kernel = functools.partial(_convnet_kernel, hp1=hp1, c1=c1, c2=c2)
    # Whole working set (< 2 MiB) fits VMEM on v5e/v6e/v7x; single program.
    # (v7x batch-scaling path: add a leading 'parallel' grid axis over rows.)
    out_full = pl.pallas_call(
        kernel,
        out_shape=jax.ShapeDtypeStruct((nr, w4.shape[1]), jnp.float32),
        grid=(1,),
        in_specs=[
            pl.BlockSpec(xin.shape, lambda i: (0, 0)),
            pl.BlockSpec(m1.shape, lambda i: (0, 0)),
            pl.BlockSpec(bias.shape, lambda i: (0, 0)),
            pl.BlockSpec(memory_space=pl.ANY),      # m2: manual prefetch
            pl.BlockSpec(memory_space=pl.ANY),      # w3: manual prefetch
            pl.BlockSpec(memory_space=pl.ANY),      # w4: manual prefetch
        ],
        out_specs=pl.BlockSpec((nr, w4.shape[1]), lambda i: (0, 0)),
        scratch_shapes=[
            pltpu.VMEM(m2.shape, m2.dtype),
            pltpu.VMEM(w3.shape, w3.dtype),
            pltpu.VMEM(w4.shape, w4.dtype),
            pltpu.SemaphoreType.DMA((3,)),
        ],
        compiler_params=pltpu.CompilerParams(
            dimension_semantics=("arbitrary",)),
    )(xin, m1, bias, m2, w3, w4)

    # Valid logits sit at rows b*hp1; slice rows/classes outside (free in XLA).
    return out_full[::hp1, :n_classes]


# ---------------------------------------------------------------------------
# Parameters & pure-JAX reference (f32) for correctness checking
# ---------------------------------------------------------------------------

def init_params(key, in_channels, oc1=32, oc2=64, k1=5, k2=3,
                n_hidden=100, n_classes=10):
    h = 14
    h = h + 2 - k1 + 1      # conv1, pad=1
    h = h // 2              # maxpool
    h = h + 2 - k2 + 1      # conv2, pad=1
    h = h // 2              # maxpool
    n_elem = oc2 * h * h    # 64 * 3 * 3 = 576

    ks = jax.random.split(key, 8)
    s = 0.05
    w1 = s * jax.random.normal(ks[0], (oc1, in_channels, k1, k1), jnp.float32)
    b1 = s * jax.random.normal(ks[1], (oc1,), jnp.float32)
    w2 = s * jax.random.normal(ks[2], (oc2, oc1, k2, k2), jnp.float32)
    b2 = s * jax.random.normal(ks[3], (oc2,), jnp.float32)
    wfc1 = s * jax.random.normal(ks[4], (n_hidden, n_elem), jnp.float32)
    bfc1 = s * jax.random.normal(ks[5], (n_hidden,), jnp.float32)
    wfc2 = s * jax.random.normal(ks[6], (n_classes, n_hidden), jnp.float32)
    bfc2 = s * jax.random.normal(ks[7], (n_classes,), jnp.float32)
    return (w1, b1, w2, b2, wfc1, bfc1, wfc2, bfc2)


def ref_forward(x_nchw, params):
    (w1, b1, w2, b2, wfc1, bfc1, wfc2, bfc2) = params

    def conv(x, w, b):
        y = lax.conv_general_dilated(
            x, w, window_strides=(1, 1), padding=[(1, 1), (1, 1)],
            dimension_numbers=("NCHW", "OIHW", "NCHW"))
        return y + b[None, :, None, None]

    def pool(x):
        return lax.reduce_window(x, -jnp.inf, lax.max,
                                 (1, 1, 2, 2), (1, 1, 2, 2), "VALID")

    y = pool(jnp.maximum(conv(x_nchw, w1, b1), 0.0))
    y = pool(jnp.maximum(conv(y, w2, b2), 0.0))
    y = y.reshape(y.shape[0], -1)
    y = jnp.maximum(y @ wfc1.T + bfc1, 0.0)
    return y @ wfc2.T + bfc2


# ---------------------------------------------------------------------------

if __name__ == "__main__":
    B, C_IN = 2, 4
    key = jax.random.PRNGKey(0)
    k_x, k_p = jax.random.split(key)

    x = jax.random.normal(k_x, (B, C_IN, 14, 14), jnp.float32)  # NCHW input
    params = init_params(k_p, in_channels=C_IN)

    # One-time weight repacking (hoisted out of the per-call path).
    weights, cfg = prepare_params(params)

    fwd = jax.jit(convnet_forward, static_argnames=("cfg",))
    out = jax.block_until_ready(fwd(x, weights, cfg=cfg))

    ref = jax.block_until_ready(ref_forward(x, params))
    assert out.shape == (B, 10), out.shape
    err = float(jnp.max(jnp.abs(out - ref)))
    assert jnp.allclose(out, ref, atol=3e-2, rtol=3e-2), (
        f"mismatch: max abs err {err}")

    print("KERNEL_OK")
</pallas_src>

<mosaic_0001>
module attributes {stable_mosaic.version = 11 : i64} {
  func.func @_convnet_kernel(%arg0: i32, %arg1: memref<32x64xbf16, #tpu.memory_space<vmem>>, %arg2: memref<320x384xbf16, #tpu.memory_space<vmem>>, %arg3: memref<4x384xf32, #tpu.memory_space<vmem>>, %arg4: memref<576x384xbf16, #tpu.memory_space<any>>, %arg5: memref<576x128xbf16, #tpu.memory_space<any>>, %arg6: memref<128x128xbf16, #tpu.memory_space<any>>, %arg7: memref<32x128xf32, #tpu.memory_space<vmem>>, %arg8: memref<576x384xbf16, #tpu.memory_space<vmem>>, %arg9: memref<576x128xbf16, #tpu.memory_space<vmem>>, %arg10: memref<128x128xbf16, #tpu.memory_space<vmem>>, %arg11: memref<3x!tpu.dma_semaphore, #tpu.memory_space<semaphore_mem>>) attributes {dimension_semantics = [#tpu.dimension_semantics<arbitrary>], iteration_bounds = array<i64: 1>, scalar_prefetch = 0 : i64, scratch_operands = 4 : i64, tpu.core_type = #tpu.core_type<tc>, window_params = [{pipeline_mode = #tpu.pipeline_mode<synchronous>, transform_indices = @transform_0, window_bounds = array<i64: 32, 64>}, {pipeline_mode = #tpu.pipeline_mode<synchronous>, transform_indices = @transform_1, window_bounds = array<i64: 320, 384>}, {pipeline_mode = #tpu.pipeline_mode<synchronous>, transform_indices = @transform_2, window_bounds = array<i64: 4, 384>}, {}, {}, {}, {pipeline_mode = #tpu.pipeline_mode<synchronous>, transform_indices = @transform_6, window_bounds = array<i64: 32, 128>}]} {
    %c0_i32 = arith.constant 0 : i32
    %0 = tpu.memref_slice %arg11[%c0_i32] : memref<3x!tpu.dma_semaphore, #tpu.memory_space<semaphore_mem>> -> memref<1x!tpu.dma_semaphore, #tpu.memory_space<semaphore_mem>>
    %1 = tpu.memref_squeeze %0 : memref<1x!tpu.dma_semaphore, #tpu.memory_space<semaphore_mem>> -> memref<!tpu.dma_semaphore, #tpu.memory_space<semaphore_mem>>
    tpu.enqueue_dma source(%arg4 : memref<576x384xbf16, #tpu.memory_space<any>>) target(%arg8 : memref<576x384xbf16, #tpu.memory_space<vmem>>) target_semaphore(%1 : memref<!tpu.dma_semaphore, #tpu.memory_space<semaphore_mem>>)
    %c1_i32 = arith.constant 1 : i32
    %2 = tpu.memref_slice %arg11[%c1_i32] : memref<3x!tpu.dma_semaphore, #tpu.memory_space<semaphore_mem>> -> memref<1x!tpu.dma_semaphore, #tpu.memory_space<semaphore_mem>>
    %3 = tpu.memref_squeeze %2 : memref<1x!tpu.dma_semaphore, #tpu.memory_space<semaphore_mem>> -> memref<!tpu.dma_semaphore, #tpu.memory_space<semaphore_mem>>
    tpu.enqueue_dma source(%arg5 : memref<576x128xbf16, #tpu.memory_space<any>>) target(%arg9 : memref<576x128xbf16, #tpu.memory_space<vmem>>) target_semaphore(%3 : memref<!tpu.dma_semaphore, #tpu.memory_space<semaphore_mem>>)
    %c2_i32 = arith.constant 2 : i32
    %4 = tpu.memref_slice %arg11[%c2_i32] : memref<3x!tpu.dma_semaphore, #tpu.memory_space<semaphore_mem>> -> memref<1x!tpu.dma_semaphore, #tpu.memory_space<semaphore_mem>>
    %5 = tpu.memref_squeeze %4 : memref<1x!tpu.dma_semaphore, #tpu.memory_space<semaphore_mem>> -> memref<!tpu.dma_semaphore, #tpu.memory_space<semaphore_mem>>
    tpu.enqueue_dma source(%arg6 : memref<128x128xbf16, #tpu.memory_space<any>>) target(%arg10 : memref<128x128xbf16, #tpu.memory_space<vmem>>) target_semaphore(%5 : memref<!tpu.dma_semaphore, #tpu.memory_space<semaphore_mem>>)
    %c0 = arith.constant 0 : index
    %c0_0 = arith.constant 0 : index
    %6 = vector.load %arg1[%c0, %c0_0] : memref<32x64xbf16, #tpu.memory_space<vmem>>, vector<32x64xbf16>
    %7 = vector.extract_strided_slice %6 {offsets = [1, 0], sizes = [31, 64], strides = [1, 1]} : vector<32x64xbf16> to vector<31x64xbf16>
    %cst = arith.constant 0.000000e+00 : bf16
    %8 = vector.broadcast %cst : bf16 to vector<1x64xbf16>
    %9 = tpu.concatenate %7, %8 in 0 : vector<31x64xbf16>, vector<1x64xbf16> -> vector<32x64xbf16>
    %10 = vector.extract_strided_slice %6 {offsets = [2, 0], sizes = [30, 64], strides = [1, 1]} : vector<32x64xbf16> to vector<30x64xbf16>
    %cst_1 = arith.constant 0.000000e+00 : bf16
    %11 = vector.broadcast %cst_1 : bf16 to vector<2x64xbf16>
    %12 = tpu.concatenate %10, %11 in 0 : vector<30x64xbf16>, vector<2x64xbf16> -> vector<32x64xbf16>
    %13 = vector.extract_strided_slice %6 {offsets = [3, 0], sizes = [29, 64], strides = [1, 1]} : vector<32x64xbf16> to vector<29x64xbf16>
    %cst_2 = arith.constant 0.000000e+00 : bf16
    %14 = vector.broadcast %cst_2 : bf16 to vector<3x64xbf16>
    %15 = tpu.concatenate %13, %14 in 0 : vector<29x64xbf16>, vector<3x64xbf16> -> vector<32x64xbf16>
    %16 = vector.extract_strided_slice %6 {offsets = [4, 0], sizes = [28, 64], strides = [1, 1]} : vector<32x64xbf16> to vector<28x64xbf16>
    %cst_3 = arith.constant 0.000000e+00 : bf16
    %17 = vector.broadcast %cst_3 : bf16 to vector<4x64xbf16>
    %18 = tpu.concatenate %16, %17 in 0 : vector<28x64xbf16>, vector<4x64xbf16> -> vector<32x64xbf16>
    %19 = tpu.concatenate %6, %9, %12, %15, %18 in 1 : vector<32x64xbf16>, vector<32x64xbf16>, vector<32x64xbf16>, vector<32x64xbf16>, vector<32x64xbf16> -> vector<32x320xbf16>
    %c0_4 = arith.constant 0 : index
    %c0_5 = arith.constant 0 : index
    %20 = vector.load %arg2[%c0_4, %c0_5] : memref<320x384xbf16, #tpu.memory_space<vmem>>, vector<320x384xbf16>
    %cst_6 = arith.constant dense<0.000000e+00> : vector<32x384xf32>
    %21 = tpu.matmul %19, %20, %cst_6 {dimension_numbers = #tpu.dot_dimension_numbers<[1], [0], [0], [1], [0, 0, 1, 1], [], []>} : vector<32x320xbf16>, vector<320x384xbf16>, vector<32x384xf32> -> vector<32x384xf32>
    %c0_7 = arith.constant 0 : index
    %c0_8 = arith.constant 0 : index
    %22 = vector.load %arg3[%c0_7, %c0_8] : memref<4x384xf32, #tpu.memory_space<vmem>>, vector<1x384xf32>
    %23 = vector.broadcast %22 : vector<1x384xf32> to vector<32x384xf32>
    %24 = arith.addf %21, %23 : vector<32x384xf32>
    %cst_9 = arith.constant 0.000000e+00 : f32
    %25 = vector.broadcast %cst_9 : f32 to vector<32x384xf32>
    %26 = arith.maximumf %24, %25 : vector<32x384xf32>
    %27 = vector.extract_strided_slice %26 {offsets = [1, 0], sizes = [31, 384], strides = [1, 1]} : vector<32x384xf32> to vector<31x384xf32>
    %cst_10 = arith.constant 0.000000e+00 : f32
    %28 = vector.broadcast %cst_10 : f32 to vector<1x384xf32>
    %29 = tpu.concatenate %27, %28 in 0 : vector<31x384xf32>, vector<1x384xf32> -> vector<32x384xf32>
    %30 = arith.maximumf %26, %29 : vector<32x384xf32>
    %31 = vector.extract_strided_slice %30 {offsets = [0, 0], sizes = [32, 32], strides = [1, 1]} : vector<32x384xf32> to vector<32x32xf32>
    %32 = vector.extract_strided_slice %30 {offsets = [0, 32], sizes = [32, 32], strides = [1, 1]} : vector<32x384xf32> to vector<32x32xf32>
    %33 = arith.maximumf %31, %32 : vector<32x32xf32>
    %34 = vector.extract_strided_slice %30 {offsets = [0, 64], sizes = [32, 32], strides = [1, 1]} : vector<32x384xf32> to vector<32x32xf32>
    %35 = vector.extract_strided_slice %30 {offsets = [0, 96], sizes = [32, 32], strides = [1, 1]} : vector<32x384xf32> to vector<32x32xf32>
    %36 = arith.maximumf %34, %35 : vector<32x32xf32>
    %37 = vector.extract_strided_slice %30 {offsets = [0, 128], sizes = [32, 32], strides = [1, 1]} : vector<32x384xf32> to vector<32x32xf32>
    %38 = vector.extract_strided_slice %30 {offsets = [0, 160], sizes = [32, 32], strides = [1, 1]} : vector<32x384xf32> to vector<32x32xf32>
    %39 = arith.maximumf %37, %38 : vector<32x32xf32>
    %40 = vector.extract_strided_slice %30 {offsets = [0, 192], sizes = [32, 32], strides = [1, 1]} : vector<32x384xf32> to vector<32x32xf32>
    %41 = vector.extract_strided_slice %30 {offsets = [0, 224], sizes = [32, 32], strides = [1, 1]} : vector<32x384xf32> to vector<32x32xf32>
    %42 = arith.maximumf %40, %41 : vector<32x32xf32>
    %43 = vector.extract_strided_slice %30 {offsets = [0, 256], sizes = [32, 32], strides = [1, 1]} : vector<32x384xf32> to vector<32x32xf32>
    %44 = vector.extract_strided_slice %30 {offsets = [0, 288], sizes = [32, 32], strides = [1, 1]} : vector<32x384xf32> to vector<32x32xf32>
    %45 = arith.maximumf %43, %44 : vector<32x32xf32>
    %46 = vector.extract_strided_slice %30 {offsets = [0, 320], sizes = [32, 32], strides = [1, 1]} : vector<32x384xf32> to vector<32x32xf32>
    %47 = vector.extract_strided_slice %30 {offsets = [0, 352], sizes = [32, 32], strides = [1, 1]} : vector<32x384xf32> to vector<32x32xf32>
    %48 = arith.maximumf %46, %47 : vector<32x32xf32>
    %49 = tpu.concatenate %33, %36, %39, %42, %45, %48 in 1 : vector<32x32xf32>, vector<32x32xf32>, vector<32x32xf32>, vector<32x32xf32>, vector<32x32xf32>, vector<32x32xf32> -> vector<32x192xf32>
    %50 = tpu.iota {dimensions = array<i32: 0>} : vector<32x192xi32>
    %c16_i32 = arith.constant 16 : i32
    %c0_i32_11 = arith.constant 0 : i32
    %51 = arith.cmpi eq, %c16_i32, %c0_i32_11 : i32
    %c1_i32_12 = arith.constant 1 : i32
    %52 = arith.select %51, %c1_i32_12, %c16_i32 : i32
    %53 = vector.broadcast %52 : i32 to vector<32x192xi32>
    %54 = arith.remsi %50, %53 : vector<32x192xi32>
    %c0_i32_13 = arith.constant 0 : i32
    %55 = vector.broadcast %c0_i32_13 : i32 to vector<32x192xi32>
    %56 = arith.cmpi ne, %54, %55 : vector<32x192xi32>
    %c0_i32_14 = arith.constant 0 : i32
    %57 = vector.broadcast %c0_i32_14 : i32 to vector<32x192xi32>
    %58 = arith.cmpi slt, %54, %57 : vector<32x192xi32>
    %c0_i32_15 = arith.constant 0 : i32
    %59 = arith.cmpi slt, %52, %c0_i32_15 : i32
    %60 = vector.broadcast %59 : i1 to vector<32x192xi1>
    %61 = vector.broadcast %60 : vector<32x192xi1> to vector<32x192xi1>
    %62 = arith.xori %58, %61 : vector<32x192xi1>
    %63 = arith.andi %62, %56 : vector<32x192xi1>
    %64 = vector.broadcast %52 : i32 to vector<32x192xi32>
    %65 = arith.addi %54, %64 : vector<32x192xi32>
    %66 = arith.select %63, %65, %54 : vector<32x192xi1>, vector<32x192xi32>
    %c12_i32 = arith.constant 12 : i32
    %67 = vector.broadcast %c12_i32 : i32 to vector<32x192xi32>
    %68 = arith.cmpi slt, %66, %67 : vector<32x192xi32>
    %cst_16 = arith.constant 0.000000e+00 : f32
    %69 = vector.broadcast %cst_16 : f32 to vector<32x192xf32>
    %70 = arith.select %68, %49, %69 : vector<32x192xi1>, vector<32x192xf32>
    %71 = arith.truncf %70 : vector<32x192xf32> to vector<32x192xbf16>
    %cst_17 = arith.constant 0.000000e+00 : bf16
    %72 = vector.broadcast %cst_17 : bf16 to vector<2x192xbf16>
    %73 = vector.extract_strided_slice %71 {offsets = [0, 0], sizes = [30, 192], strides = [1, 1]} : vector<32x192xbf16> to vector<30x192xbf16>
    %74 = tpu.concatenate %72, %73 in 0 : vector<2x192xbf16>, vector<30x192xbf16> -> vector<32x192xbf16>
    %75 = vector.extract_strided_slice %71 {offsets = [2, 0], sizes = [30, 192], strides = [1, 1]} : vector<32x192xbf16> to vector<30x192xbf16>
    %cst_18 = arith.constant 0.000000e+00 : bf16
    %76 = vector.broadcast %cst_18 : bf16 to vector<2x192xbf16>
    %77 = tpu.concatenate %75, %76 in 0 : vector<30x192xbf16>, vector<2x192xbf16> -> vector<32x192xbf16>
    %78 = tpu.concatenate %74, %71, %77 in 1 : vector<32x192xbf16>, vector<32x192xbf16>, vector<32x192xbf16> -> vector<32x576xbf16>
    %c0_i32_19 = arith.constant 0 : i32
    %79 = tpu.memref_slice %arg11[%c0_i32_19] : memref<3x!tpu.dma_semaphore, #tpu.memory_space<semaphore_mem>> -> memref<1x!tpu.dma_semaphore, #tpu.memory_space<semaphore_mem>>
    %80 = tpu.memref_squeeze %79 : memref<1x!tpu.dma_semaphore, #tpu.memory_space<semaphore_mem>> -> memref<!tpu.dma_semaphore, #tpu.memory_space<semaphore_mem>>
    tpu.wait_dma2 semaphore(%80 : memref<!tpu.dma_semaphore, #tpu.memory_space<semaphore_mem>>) src(%arg4 : memref<576x384xbf16, #tpu.memory_space<any>>) dst(%arg8 : memref<576x384xbf16, #tpu.memory_space<vmem>>)
    %c0_20 = arith.constant 0 : index
    %c0_21 = arith.constant 0 : index
    %81 = vector.load %arg8[%c0_20, %c0_21] : memref<576x384xbf16, #tpu.memory_space<vmem>>, vector<576x384xbf16>
    %cst_22 = arith.constant dense<0.000000e+00> : vector<32x384xf32>
    %82 = tpu.matmul %78, %81, %cst_22 {dimension_numbers = #tpu.dot_dimension_numbers<[1], [0], [0], [1], [0, 0, 1, 1], [], []>} : vector<32x576xbf16>, vector<576x384xbf16>, vector<32x384xf32> -> vector<32x384xf32>
    %c1 = arith.constant 1 : index
    %c0_23 = arith.constant 0 : index
    %83 = vector.load %arg3[%c1, %c0_23] : memref<4x384xf32, #tpu.memory_space<vmem>>, vector<1x384xf32>
    %84 = vector.broadcast %83 : vector<1x384xf32> to vector<32x384xf32>
    %85 = arith.addf %82, %84 : vector<32x384xf32>
    %cst_24 = arith.constant 0.000000e+00 : f32
    %86 = vector.broadcast %cst_24 : f32 to vector<32x384xf32>
    %87 = arith.maximumf %85, %86 : vector<32x384xf32>
    %88 = vector.extract_strided_slice %87 {offsets = [2, 0], sizes = [30, 384], strides = [1, 1]} : vector<32x384xf32> to vector<30x384xf32>
    %cst_25 = arith.constant 0.000000e+00 : f32
    %89 = vector.broadcast %cst_25 : f32 to vector<2x384xf32>
    %90 = tpu.concatenate %88, %89 in 0 : vector<30x384xf32>, vector<2x384xf32> -> vector<32x384xf32>
    %91 = arith.maximumf %87, %90 : vector<32x384xf32>
    %92 = vector.extract_strided_slice %91 {offsets = [0, 0], sizes = [32, 64], strides = [1, 1]} : vector<32x384xf32> to vector<32x64xf32>
    %93 = vector.extract_strided_slice %91 {offsets = [0, 64], sizes = [32, 64], strides = [1, 1]} : vector<32x384xf32> to vector<32x64xf32>
    %94 = arith.maximumf %92, %93 : vector<32x64xf32>
    %95 = vector.extract_strided_slice %91 {offsets = [0, 128], sizes = [32, 64], strides = [1, 1]} : vector<32x384xf32> to vector<32x64xf32>
    %96 = vector.extract_strided_slice %91 {offsets = [0, 192], sizes = [32, 64], strides = [1, 1]} : vector<32x384xf32> to vector<32x64xf32>
    %97 = arith.maximumf %95, %96 : vector<32x64xf32>
    %98 = vector.extract_strided_slice %91 {offsets = [0, 256], sizes = [32, 64], strides = [1, 1]} : vector<32x384xf32> to vector<32x64xf32>
    %99 = vector.extract_strided_slice %91 {offsets = [0, 320], sizes = [32, 64], strides = [1, 1]} : vector<32x384xf32> to vector<32x64xf32>
    %100 = arith.maximumf %98, %99 : vector<32x64xf32>
    %101 = tpu.concatenate %94, %97, %100 in 1 : vector<32x64xf32>, vector<32x64xf32>, vector<32x64xf32> -> vector<32x192xf32>
    %102 = arith.truncf %101 : vector<32x192xf32> to vector<32x192xbf16>
    %103 = vector.extract_strided_slice %102 {offsets = [4, 0], sizes = [28, 192], strides = [1, 1]} : vector<32x192xbf16> to vector<28x192xbf16>
    %cst_26 = arith.constant 0.000000e+00 : bf16
    %104 = vector.broadcast %cst_26 : bf16 to vector<4x192xbf16>
    %105 = tpu.concatenate %103, %104 in 0 : vector<28x192xbf16>, vector<4x192xbf16> -> vector<32x192xbf16>
    %106 = vector.extract_strided_slice %102 {offsets = [8, 0], sizes = [24, 192], strides = [1, 1]} : vector<32x192xbf16> to vector<24x192xbf16>
    %cst_27 = arith.constant 0.000000e+00 : bf16
    %107 = vector.broadcast %cst_27 : bf16 to vector<8x192xbf16>
    %108 = tpu.concatenate %106, %107 in 0 : vector<24x192xbf16>, vector<8x192xbf16> -> vector<32x192xbf16>
    %109 = tpu.concatenate %102, %105, %108 in 1 : vector<32x192xbf16>, vector<32x192xbf16>, vector<32x192xbf16> -> vector<32x576xbf16>
    %c1_i32_28 = arith.constant 1 : i32
    %110 = tpu.memref_slice %arg11[%c1_i32_28] : memref<3x!tpu.dma_semaphore, #tpu.memory_space<semaphore_mem>> -> memref<1x!tpu.dma_semaphore, #tpu.memory_space<semaphore_mem>>
    %111 = tpu.memref_squeeze %110 : memref<1x!tpu.dma_semaphore, #tpu.memory_space<semaphore_mem>> -> memref<!tpu.dma_semaphore, #tpu.memory_space<semaphore_mem>>
    tpu.wait_dma2 semaphore(%111 : memref<!tpu.dma_semaphore, #tpu.memory_space<semaphore_mem>>) src(%arg5 : memref<576x128xbf16, #tpu.memory_space<any>>) dst(%arg9 : memref<576x128xbf16, #tpu.memory_space<vmem>>)
    %c0_29 = arith.constant 0 : index
    %c0_30 = arith.constant 0 : index
    %112 = vector.load %arg9[%c0_29, %c0_30] : memref<576x128xbf16, #tpu.memory_space<vmem>>, vector<576x128xbf16>
    %cst_31 = arith.constant dense<0.000000e+00> : vector<32x128xf32>
    %113 = tpu.matmul %109, %112, %cst_31 {dimension_numbers = #tpu.dot_dimension_numbers<[1], [0], [0], [1], [0, 0, 1, 1], [], []>} : vector<32x576xbf16>, vector<576x128xbf16>, vector<32x128xf32> -> vector<32x128xf32>
    %c2 = arith.constant 2 : index
    %c0_32 = arith.constant 0 : index
    %114 = vector.load %arg3[%c2, %c0_32] : memref<4x384xf32, #tpu.memory_space<vmem>>, vector<1x128xf32>
    %115 = vector.broadcast %114 : vector<1x128xf32> to vector<32x128xf32>
    %116 = arith.addf %113, %115 : vector<32x128xf32>
    %cst_33 = arith.constant 0.000000e+00 : f32
    %117 = vector.broadcast %cst_33 : f32 to vector<32x128xf32>
    %118 = arith.maximumf %116, %117 : vector<32x128xf32>
    %c2_i32_34 = arith.constant 2 : i32
    %119 = tpu.memref_slice %arg11[%c2_i32_34] : memref<3x!tpu.dma_semaphore, #tpu.memory_space<semaphore_mem>> -> memref<1x!tpu.dma_semaphore, #tpu.memory_space<semaphore_mem>>
    %120 = tpu.memref_squeeze %119 : memref<1x!tpu.dma_semaphore, #tpu.memory_space<semaphore_mem>> -> memref<!tpu.dma_semaphore, #tpu.memory_space<semaphore_mem>>
    tpu.wait_dma2 semaphore(%120 : memref<!tpu.dma_semaphore, #tpu.memory_space<semaphore_mem>>) src(%arg6 : memref<128x128xbf16, #tpu.memory_space<any>>) dst(%arg10 : memref<128x128xbf16, #tpu.memory_space<vmem>>)
    %121 = arith.truncf %118 : vector<32x128xf32> to vector<32x128xbf16>
    %c0_35 = arith.constant 0 : index
    %c0_36 = arith.constant 0 : index
    %122 = vector.load %arg10[%c0_35, %c0_36] : memref<128x128xbf16, #tpu.memory_space<vmem>>, vector<128x128xbf16>
    %cst_37 = arith.constant dense<0.000000e+00> : vector<32x128xf32>
    %123 = tpu.matmul %121, %122, %cst_37 {dimension_numbers = #tpu.dot_dimension_numbers<[1], [0], [0], [1], [0, 0, 1, 1], [], []>} : vector<32x128xbf16>, vector<128x128xbf16>, vector<32x128xf32> -> vector<32x128xf32>
    %c3 = arith.constant 3 : index
    %c0_38 = arith.constant 0 : index
    %124 = vector.load %arg3[%c3, %c0_38] : memref<4x384xf32, #tpu.memory_space<vmem>>, vector<1x128xf32>
    %125 = vector.broadcast %124 : vector<1x128xf32> to vector<32x128xf32>
    %126 = arith.addf %123, %125 : vector<32x128xf32>
    %c0_39 = arith.constant 0 : index
    %c0_40 = arith.constant 0 : index
    %127 = vector.load %arg7[%c0_39, %c0_40] : memref<32x128xf32, #tpu.memory_space<vmem>>, vector<32x128xf32>
    tpu.vector_store %arg7[%c0_39, %c0_40], %126 {strides = array<i32>} : memref<32x128xf32, #tpu.memory_space<vmem>>, vector<32x128xf32>,
    return
  }
  func.func @transform_0(%arg0: i32) -> (i32, i32) {
    %c0_i32 = arith.constant 0 : i32
    %c0_i32_0 = arith.constant 0 : i32
    %c0_i32_1 = arith.constant 0 : i32
    return %c0_i32, %c0_i32_0 : i32, i32
  }
  func.func @transform_1(%arg0: i32) -> (i32, i32) {
    %c0_i32 = arith.constant 0 : i32
    %c0_i32_0 = arith.constant 0 : i32
    %c0_i32_1 = arith.constant 0 : i32
    return %c0_i32, %c0_i32_0 : i32, i32
  }
  func.func @transform_2(%arg0: i32) -> (i32, i32) {
    %c0_i32 = arith.constant 0 : i32
    %c0_i32_0 = arith.constant 0 : i32
    %c0_i32_1 = arith.constant 0 : i32
    return %c0_i32, %c0_i32_0 : i32, i32
  }
  func.func @transform_6(%arg0: i32) -> (i32, i32) {
    %c0_i32 = arith.constant 0 : i32
    %c0_i32_0 = arith.constant 0 : i32
    %c0_i32_1 = arith.constant 0 : i32
    return %c0_i32, %c0_i32_0 : i32, i32
  }
}

</mosaic_0001>

<bundles_post_ra>
// kernel: convnet_forward.1
= control target key start
LH: loop header
LB: loop body
LE: loop exit
PB: predicated region body
PF: predicated region fallthrough
CT: control target
= control target key end

     0   :  { %11 = vsyncpa [#allocation7], 0  ;;  %s3937_s21 = smov [#allocation6]   ;;  %s4542_s0 = inlined_call_operand.vmem [shape: bf16[32,64], index: 0, kind: input, shape index: {}]   ;;  %s4543_s1 = inlined_call_operand.vmem [shape: bf16[320,384], index: 1, kind: input, shape index: {}]   ;;  %s4544_s2 = inlined_call_operand.hbm [shape: f32[4,384], index: 2, kind: input, shape index: {}]   ;;  %s4545_s3 = inlined_call_operand.hbm [shape: bf16[576,384], index: 3, kind: input, shape index: {}]   ;;  %s4546_s4 = inlined_call_operand.hbm [shape: bf16[576,128], index: 4, kind: input, shape index: {}]   ;;  %s4547_s5 = inlined_call_operand.vmem [shape: bf16[128,128], index: 5, kind: input, shape index: {}]   ;;  %s4548_s6 = inlined_call_operand.vmem [shape: f32[32,128], index: 6, kind: output, shape index: {}]  }
   0x1   :  { %s22_s22 = sshll.u32 %s3937_s21, 4  ;;  %s23_s22 = int_to_ptr.vmem [resolvable:$true] %s22_s22 }
   0x2   :  { %s3877_s23 = scalar_lea.vmem %s23_s22, 192  ;;  %p3882_p1 = scmp.lt.s32.totalorder %s23_s22, %s23_s22 }
   0x3   :  { %p3878_p0 = scmp.ne.s32.totalorder %s23_s22, %s3877_s23  ;;  %p3883_p2 = scmp.lt.s32.totalorder %s3877_s23, %s3877_s23 }
   0x5   :  { %p3884_p3 = por %p3883_p2, %p3882_p1 }
   0x7   :  { %p3885_p4 = pnand %p3884_p3, %p3878_p0 }
   0x9   :  { %3888 = shalt.err (!%p3885_p4)
}
   0xa   :  { %25 = dma.hbm_to_vmem [thread:$0]  %s4544_s2, 192, %s23_s22, [#allocation7]  }
   0xb   :  { %3929 = dma.done.wait [#allocation7], 192  }
   0xc   :  { %3930 = vsyncadd [#allocation7], 4294967104  ;;  %s3938_s26 = smov [#allocation2]   ;;  %s3939_s28 = smov [#allocation3]  }
   0xd   :  { %s37_s27 = sshll.u32 %s3938_s26, 4  ;;  %s49_s29 = sshll.u32 %s3939_s28, 4  ;;  %s38_s27 = int_to_ptr.vmem [resolvable:$true] %s37_s27  ;;  %s50_s29 = int_to_ptr.vmem [resolvable:$true] %s49_s29 }
   0xe   :  { %s3897_s30 = scalar_lea.vmem %s38_s27, 13824  ;;  %p3902_p6 = scmp.lt.s32.totalorder %s38_s27, %s38_s27 }
   0xf   :  { %p3898_p5 = scmp.ne.s32.totalorder %s38_s27, %s3897_s30  ;;  %p3903_p7 = scmp.lt.s32.totalorder %s3897_s30, %s3897_s30 }
  0x11   :  { %p3904_p8 = por %p3903_p7, %p3902_p6 }
  0x13   :  { %p3905_p9 = pnand %p3904_p8, %p3898_p5 }
  0x15   :  { %3908 = shalt.err (!%p3905_p9)  }
  0x16   :  { %40 = dma.hbm_to_vmem [thread:$0]  %s4545_s3, 13824, %s38_s27, [#allocation5] }
  0x17   :  { %s3917_s2 = scalar_lea.vmem %s50_s29, 4608  ;;  %p3922_p11 = scmp.lt.s32.totalorder %s50_s29, %s50_s29 }
  0x18   :  { %p3918_p10 = scmp.ne.s32.totalorder %s50_s29, %s3917_s2  ;;  %p3923_p12 = scmp.lt.s32.totalorder %s3917_s2, %s3917_s2 }
  0x1a   :  { %p3924_p13 = por %p3923_p12, %p3922_p11 }
  0x1c   :  { %p3925_p0 = pnand %p3924_p13, %p3918_p10 }
  0x1e   :  { %3928 = shalt.err (!%p3925_p0)  }
  0x1f   :  { %52 = dma.hbm_to_vmem [thread:$0]  %s4546_s4, 4608, %s50_s29, [#allocation5 + $0x1]  ;;  %v87_v0 = vld [vmem:[%s4547_s5] sm:$0xff]  ;;  %v89_v1 = vld [vmem:[%s4547_s5 + $0x8] sm:$0xff]  ;;  %v91_v2 = vld [vmem:[%s4547_s5 + $0x10] sm:$0xff]  ;;  %vm145_vm2 = vcmask 1046528  }
  0x20   :  { %88 = vst [vmem:[#allocation4] sm:$0xff] %v87_v0  ;;  %90 = vst [vmem:[#allocation4 + $0x8] sm:$0xff] %v89_v1  ;;  %v93_v3 = vld [vmem:[%s4547_s5 + $0x18] sm:$0xff]  ;;  %v95_v4 = vld [vmem:[%s4547_s5 + $0x20] sm:$0xff]  ;;  %vm153_vm0 = vsmask.f32 6400 }
  0x21   :  { %92 = vst [vmem:[#allocation4 + $0x10] sm:$0xff] %v91_v2  ;;  %v97_v5 = vld [vmem:[%s4547_s5 + $0x28] sm:$0xff]  ;;  %94 = vst [vmem:[#allocation4 + $0x18] sm:$0xff] %v93_v3  ;;  %v99_v6 = vld [vmem:[%s4547_s5 + $0x30] sm:$0xff]  ;;  %vm125_vm1 = vsmask.f32 7424 }
  0x22   :  { %96 = vst [vmem:[#allocation4 + $0x20] sm:$0xff] %v95_v4  ;;  %98 = vst [vmem:[#allocation4 + $0x28] sm:$0xff] %v97_v5  ;;  %v101_v7 = vld [vmem:[%s4547_s5 + $0x38] sm:$0xff]  ;;  %v4015_v8 = vld [vmem:[%s4542_s0] sm:$0xff]   ;;  %vm142_vm4 = vcmask 1047552  }
  0x23   :  { %100 = vst [vmem:[#allocation4 + $0x30] sm:$0xff] %v99_v6  ;;  %102 = vst [vmem:[#allocation4 + $0x38] sm:$0xff] %v101_v7  ;;  %v4020_v9 = vld [vmem:[%s4542_s0 + $0x8] sm:$0xff]   ;;  %v127_v10 = vshrl.u32 %v4015_v8, 16  ;;  %v129_v11 = vshll.u32 %v4015_v8, 16 }
  0x24   :  { %v134_v12 = vshll.u32 %v4020_v9, 16  ;;  %v138_v13 = vshrl.u32 %v4020_v9, 16  ;;  %vm4028_vm3 = vmand %vm145_vm2, %vm153_vm0  ;;  %v3561_v15 = vld [vmem:[%s4543_s1 + $0xac] ss:$12 sps:$4 sm:$0xff]   ;;  %v3563_v16 = vld [vmem:[%s4543_s1 + $0xa8] ss:$12 sps:$4 sm:$0xff]  }
  0x25   :  { %v154_v17 = vrot.slane %v127_v10, 1  ;;  %v155_v18 = vrot.slane %v129_v11, 2 }
  0x26   :  { %v157_v19 = vrot.slane %v138_v13, 1  ;;  %v158_v20 = vrot.slane %v134_v12, 2 }
  0x27   :  { %110 = vsyncadd [#allocation5 + $0x2], 1024  ;;  %v3940_v21 = vmov 0   ;;  %v131_v22 = vrot.slane %v129_v11, 1  ;;  %v136_v23 = vrot.slane %v134_v12, 1  ;;  %617 = vmatprep.subr.bf16.mxu0 %v3561_v15  ;;  %v156_v25 = vor.u32 %v155_v18, %v154_v17  ;;  %s3941_s15 = smov 64  }
  0x28   :  { %702 = vmatprep.mubr.bf16.mxu1 %v3940_v21  ;;  %v3564_v24 = vld [vmem:[%s4543_s1 + $0x94] ss:$12 sps:$4 sm:$0xff]   ;;  %v159_v26 = vor.u32 %v158_v20, %v157_v19  ;;  %vm4044_vm5 = vmand %vm142_vm4, %vm125_vm1  ;;  %618 = vmatpush1.bf16.msra.mxu0 %v3563_v16  ;;  %v3566_v28 = vld [vmem:[%s4543_s1 + $0x90] ss:$12 sps:$4 sm:$0xff]   ;;  %vm164_vm6 = vcmask 1045504   ;;  %v165_v48 = vrot.slane %v4015_v8, 2 }
  0x29   :  { %v132_v29 = vor.u32 %v131_v22, %v127_v10  ;;  %v140_v30 = vor.u32 %v138_v13, %v136_v23  ;;  %619 = vmatprep.subr.bf16.mxu0 %v3564_v24  ;;  %v3567_v31 = vld [vmem:[%s4543_s1 + $0x7c] ss:$12 sps:$4 sm:$0xff]   ;;  %v3570_v34 = vld [vmem:[%s4543_s1 + $0x1cc] ss:$12 sps:$4 sm:$0xff]   ;;  %v3573_v39 = vld [vmem:[%s4543_s1 + $0x64] ss:$12 sps:$4 sm:$0xff]  }
  0x2a   :  { %v160_v32 = vsel %vm153_vm0, %v156_v25, %v159_v26  ;;  %v163_v33 = vsel %vm4028_vm3, %v159_v26, 0  ;;  %v3572_v35 = vld [vmem:[%s4543_s1 + $0x1c8] ss:$12 sps:$4 sm:$0xff]   ;;  %v3569_v36 = vld [vmem:[%s4543_s1 + $0x78] ss:$12 sps:$4 sm:$0xff]   ;;  %678 = vmatprep.subr.bf16.mxu1 %v3570_v34  ;;  %v166_v51 = vrot.slane %v4020_v9, 2 }
  0x2b   :  { %177 = vrot.lane.b32.xlu0 %v160_v32, %s3941_s15  ;;  %179 = vrot.lane.b32.xlu1 %v163_v33, %s3941_s15  ;;  %v137_v37 = vsel %vm125_vm1, %v132_v29, %v136_v23  ;;  %v144_v38 = vsel %vm4044_vm5, %v140_v30, 0  ;;  %v3576_v40 = vld [vmem:[%s4543_s1 + $0x1b4] ss:$12 sps:$4 sm:$0xff]   ;;  %v3578_v41 = vld [vmem:[%s4543_s1 + $0x1b0] ss:$12 sps:$4 sm:$0xff]   ;;  %vm181_vm7 = vcmask 523264  }
  0x2c   :  { %620 = vmatpush1.bf16.msra.mxu0 %v3566_v28  ;;  %679 = vmatpush1.bf16.msra.mxu1 %v3572_v35  ;;  %v3575_v42 = vld [vmem:[%s4543_s1 + $0x60] ss:$12 sps:$4 sm:$0xff]   ;;  %v3582_v43 = vld [vmem:[%s4543_s1 + $0x19c] ss:$12 sps:$4 sm:$0xff]   ;;  %v3584_v45 = vld [vmem:[%s4543_s1 + $0x198] ss:$12 sps:$4 sm:$0xff]   ;;  %v4118_v55 = vsel %vm164_vm6, %v165_v48, %v166_v51 }
  0x2d   :  { %621 = vmatprep.subr.bf16.mxu0 %v3567_v31  ;;  %680 = vmatprep.subr.bf16.mxu1 %v3576_v40  ;;  %v3579_v44 = vld [vmem:[%s4543_s1 + $0x4c] ss:$12 sps:$4 sm:$0xff]   ;;  %v3588_v46 = vld [vmem:[%s4543_s1 + $0x184] ss:$12 sps:$4 sm:$0xff]   ;;  %v3581_v47 = vld [vmem:[%s4543_s1 + $0x48] ss:$12 sps:$4 sm:$0xff]  }
  0x2e   :  { %v3585_v49 = vld [vmem:[%s4543_s1 + $0x34] ss:$12 sps:$4 sm:$0xff]   ;;  %v3597_v52 = vld [vmem:[%s4543_s1 + $0x170] ss:$12 sps:$4 sm:$0xff]   ;;  %v3602_v57 = vld [vmem:[%s4543_s1 + $0x158] ss:$12 sps:$4 sm:$0xff]  }
  0x2f   :  { %172 = vrot.lane.b32.xlu0 %v137_v37, %s3941_s15  ;;  %174 = vrot.lane.b32.xlu1 %v144_v38, %s3941_s15  ;;  %v3590_v50 = vld [vmem:[%s4543_s1 + $0x180] ss:$12 sps:$4 sm:$0xff]   ;;  %v3587_v53 = vld [vmem:[%s4543_s1 + $0x30] ss:$12 sps:$4 sm:$0xff]   ;;  %v4151_v1 = vsel %vm164_vm6, %v166_v51, 0  ;;  %v146_v31 = vrot.slane %v4015_v8, 1 }
  0x30   :  { %622 = vmatpush1.bf16.msra.mxu0 %v3569_v36  ;;  %681 = vmatpush1.bf16.msra.mxu1 %v3578_v41  ;;  %v3591_v54 = vld [vmem:[%s4543_s1 + $0x1c] ss:$12 sps:$4 sm:$0xff]   ;;  %v3593_v58 = vld [vmem:[%s4543_s1 + $0x18] ss:$12 sps:$4 sm:$0xff]   ;;  %v3607_v61 = vld [vmem:[%s4543_s1 + $0x140] ss:$12 sps:$4 sm:$0xff]  }
  0x31   :  { %623 = vmatprep.subr.bf16.mxu0 %v3573_v39  ;;  %682 = vmatprep.subr.bf16.mxu1 %v3582_v43  ;;  %v3600_v56 = vld [vmem:[%s4543_s1 + $0xb0] ss:$12 sps:$4 sm:$0xff]   ;;  %v3605_v60 = vld [vmem:[%s4543_s1 + $0x98] ss:$12 sps:$4 sm:$0xff]   ;;  %v3596_v62 = vld [vmem:[%s4543_s1] ss:$12 sps:$4 sm:$0xff]  }
  0x32   :  { %v3594_v59 = vld [vmem:[%s4543_s1 + $0x4] ss:$12 sps:$4 sm:$0xff]   ;;  %v3598_v63 = vld [vmem:[%s4543_s1 + $0x16c] ss:$12 sps:$4 sm:$0xff]   ;;  %v3612_v2 = vld [vmem:[%s4543_s1 + $0x128] ss:$12 sps:$4 sm:$0xff]  }
  0x33   :  { %v3610_v0 = vld [vmem:[%s4543_s1 + $0x80] ss:$12 sps:$4 sm:$0xff]   ;;  %v3601_v3 = vld [vmem:[%s4543_s1 + $0x168] ss:$12 sps:$4 sm:$0xff]   ;;  %v3617_v6 = vld [vmem:[%s4543_s1 + $0x110] ss:$12 sps:$4 sm:$0xff]  }
  0x34   :  { %624 = vmatpush1.bf16.msra.mxu0 %v3575_v42  ;;  %683 = vmatpush1.bf16.msra.mxu1 %v3584_v45  ;;  %v3603_v4 = vld [vmem:[%s4543_s1 + $0x154] ss:$12 sps:$4 sm:$0xff]   ;;  %v3606_v7 = vld [vmem:[%s4543_s1 + $0x150] ss:$12 sps:$4 sm:$0xff]   ;;  %v3622_v12 = vld [vmem:[%s4543_s1 + $0xf8] ss:$12 sps:$4 sm:$0xff]  }
  0x35   :  { %625 = vmatprep.subr.bf16.mxu0 %v3579_v44  ;;  %684 = vmatprep.subr.bf16.mxu1 %v3588_v46  ;;  %v3615_v5 = vld [vmem:[%s4543_s1 + $0x68] ss:$12 sps:$4 sm:$0xff]   ;;  %v3620_v11 = vld [vmem:[%s4543_s1 + $0x50] ss:$12 sps:$4 sm:$0xff]   ;;  %v3611_v13 = vld [vmem:[%s4543_s1 + $0x138] ss:$12 sps:$4 sm:$0xff]  }
  0x36   :  { %v3608_v10 = vld [vmem:[%s4543_s1 + $0x13c] ss:$12 sps:$4 sm:$0xff]   ;;  %v3613_v14 = vld [vmem:[%s4543_s1 + $0x124] ss:$12 sps:$4 sm:$0xff]   ;;  %v3627_v16 = vld [vmem:[%s4543_s1 + $0xe0] ss:$12 sps:$4 sm:$0xff]  }
  0x37   :  { %v3625_v15 = vld [vmem:[%s4543_s1 + $0x38] ss:$12 sps:$4 sm:$0xff]   ;;  %v3616_v17 = vld [vmem:[%s4543_s1 + $0x120] ss:$12 sps:$4 sm:$0xff]   ;;  %v3632_v20 = vld [vmem:[%s4543_s1 + $0xc8] ss:$12 sps:$4 sm:$0xff]  }
  0x38   :  { %626 = vmatpush1.bf16.msra.mxu0 %v3581_v47  ;;  %685 = vmatpush1.bf16.msra.mxu1 %v3590_v50  ;;  %v3618_v18 = vld [vmem:[%s4543_s1 + $0x10c] ss:$12 sps:$4 sm:$0xff]   ;;  %v3621_v22 = vld [vmem:[%s4543_s1 + $0x108] ss:$12 sps:$4 sm:$0xff]   ;;  %v3637_v25 = vld [vmem:[%s4543_s1 + $0x1d0] ss:$12 sps:$4 sm:$0xff]  }
  0x39   :  { %627 = vmatprep.subr.bf16.mxu0 %v3585_v49  ;;  %3258 = vmatprep.subr.bf16.mxu1 %v3597_v52  ;;  %v3630_v19 = vld [vmem:[%s4543_s1 + $0x20] ss:$12 sps:$4 sm:$0xff]   ;;  %v3635_v24 = vld [vmem:[%s4543_s1 + $0x8] ss:$12 sps:$4 sm:$0xff]   ;;  %v3626_v26 = vld [vmem:[%s4543_s1 + $0xf0] ss:$12 sps:$4 sm:$0xff]   ;;  %v277_v49 = vlaneseq }
  0x3a   :  { %v3623_v23 = vld [vmem:[%s4543_s1 + $0xf4] ss:$12 sps:$4 sm:$0xff]   ;;  %v3628_v27 = vld [vmem:[%s4543_s1 + $0xdc] ss:$12 sps:$4 sm:$0xff]   ;;  %v3631_v28 = vld [vmem:[%s4543_s1 + $0xd8] ss:$12 sps:$4 sm:$0xff]  }
  0x3b   :  { %3084 = vmatmul.mubr.msk.bf16.vlgmr.msra.gmra.mxu1 %vm181_vm7, %v4118_v55  ;;  %v3633_v29 = vld [vmem:[%s4543_s1 + $0xc4] ss:$12 sps:$4 sm:$0xff]   ;;  %v3636_v30 = vld [vmem:[%s4543_s1 + $0xc0] ss:$12 sps:$4 sm:$0xff]   ;;  %v147_v32 = vrot.slane %v4020_v9, 1  ;;  %v4256_v51 = vshrl.u32 %v277_v49, 7 }
  0x3c   :  { %628 = vmatpush1.bf16.msra.mxu0 %v3587_v53  ;;  %3259 = vmatpush3.bf16.msra.mxu1 %v3600_v56  ;;  %v3638_v39 = vld [vmem:[%s4543_s1 + $0x1b8] ss:$12 sps:$4 sm:$0xff]   ;;  %v3639_v43 = vld [vmem:[%s4543_s1 + $0x1a0] ss:$12 sps:$4 sm:$0xff]   ;;  %s3943_s10 = smov 32   ;;  %vm1013_vm8 = vcmask 261120  }
  0x3d   :  { %629 = vmatprep.subr.bf16.mxu0 %v3591_v54  ;;  %3260 = vmatprep.subr.bf16.mxu1 %v3602_v57  ;;  %v148_v33 = vsel %vm145_vm2, %v146_v31, %v147_v32  ;;  %v152_v37 = vsel %vm145_vm2, %v147_v32, 0  ;;  %v279_v53 = vsub.s32 0, %v4256_v51  ;;  %v275_v54 = vld [vmem:[#allocation6] ss:$4 sm:$0x7]  ;;  %v283_v57 = vsub.s32 1, %v4256_v51 }
  0x3e   :  { %712 = vmatprep.mubr.bf16.mxu1 %v3940_v21  ;;  %vm1022_vm9 = vcmask 785408   ;;  %vm1104_vm12 = vcmask 1040384  }
  0x40   :  { %630 = vmatpush1.bf16.msra.mxu0 %v3593_v58  ;;  %3261 = vmatpush3.bf16.msra.mxu1 %v3605_v60 }
  0x41   :  { %631 = vmatprep.subr.bf16.mxu0 %v3594_v59  ;;  %3262 = vmatprep.subr.bf16.mxu1 %v3607_v61  ;;  %v284_v61 = vrot.slane %v275_v54, %v283_v57 }
  0x43   :  { %3085 = vmatmul.mubr.msk.bf16.gmra.mxu1 %vm181_vm7, %v4151_v1 }
  0x44   :  { %632 = vmatpush1.bf16.msra.mxu0 %v3596_v62  ;;  %3263 = vmatpush3.bf16.msra.mxu1 %v3610_v0 }
  0x45   :  { %633 = vmatprep.subr.bf16.mxu0 %v3598_v63  ;;  %3264 = vmatprep.subr.bf16.mxu1 %v3612_v2 }
  0x48   :  { %634 = vmatpush2.bf16.msra.mxu0 %v3601_v3  ;;  %3265 = vmatpush3.bf16.msra.mxu1 %v3615_v5 }
  0x49   :  { %635 = vmatprep.subr.bf16.mxu0 %v3603_v4  ;;  %3266 = vmatprep.subr.bf16.mxu1 %v3617_v6 }
  0x4c   :  { %636 = vmatpush2.bf16.msra.mxu0 %v3606_v7  ;;  %3267 = vmatpush3.bf16.msra.mxu1 %v3620_v11 }
  0x4d   :  { %637 = vmatprep.subr.bf16.mxu0 %v3608_v10  ;;  %3268 = vmatprep.subr.bf16.mxu1 %v3622_v12 }
  0x50   :  { %638 = vmatpush2.bf16.msra.mxu0 %v3611_v13  ;;  %3269 = vmatpush3.bf16.msra.mxu1 %v3625_v15  ;;  %v287_v13 = vsub.s32 2, %v4256_v51 }
  0x51   :  { %639 = vmatprep.subr.bf16.mxu0 %v3613_v14  ;;  %3270 = vmatprep.subr.bf16.mxu1 %v3627_v16 }
  0x54   :  { %640 = vmatpush2.bf16.msra.mxu0 %v3616_v17  ;;  %3271 = vmatpush3.bf16.msra.mxu1 %v3630_v19 }
  0x55   :  { %641 = vmatprep.subr.bf16.mxu0 %v3618_v18  ;;  %3272 = vmatprep.subr.bf16.mxu1 %v3632_v20 }
  0x58   :  { %642 = vmatpush2.bf16.msra.mxu0 %v3621_v22  ;;  %3273 = vmatpush3.bf16.msra.mxu1 %v3635_v24 }
  0x59   :  { %643 = vmatprep.subr.bf16.mxu0 %v3623_v23  ;;  %3426 = vmatprep.subr.bf16.mxu1 %v3637_v25 }
  0x5c   :  { %644 = vmatpush2.bf16.msra.mxu0 %v3626_v26 }
  0x5d   :  { %645 = vmatprep.subr.bf16.mxu0 %v3628_v27 }
  0x60   :  { %646 = vmatpush2.bf16.msra.mxu0 %v3631_v28 }
  0x61   :  { %647 = vmatprep.subr.bf16.mxu0 %v3633_v29  ;;  %v288_v29 = vrot.slane %v275_v54, %v287_v13 }
  0x64   :  { %648 = vmatpush2.bf16.msra.mxu0 %v3636_v30 }
  0x9d   :  { %v178_v34 = vpop.permute.xlu0 %177  ;;  %v180_v36 = vpop.permute.xlu1 %179 }
  0x9e   :  { %v190_v35 = vsel %vm181_vm7, %v148_v33, %v178_v34  ;;  %v193_v40 = vsel %vm181_vm7, %v152_v37, %v180_v36 }
  0x9f   :  { %649 = vmatprep.mubr.bf16.mxu0 %v190_v35  ;;  %755 = vmatprep.mubr.bf16.mxu1 %v190_v35 }
  0xa1   :  { %v173_v38 = vpop.permute.xlu0 %172  ;;  %v175_v42 = vpop.permute.xlu1 %174 }
  0xa2   :  { %v183_v41 = vsel %vm181_vm7, %v4015_v8, %v173_v38  ;;  %v186_v44 = vsel %vm181_vm7, %v4020_v9, %v175_v42  ;;  %v3640_v8 = vld [vmem:[%s4543_s1 + $0x188] ss:$12 sps:$4 sm:$0xff]   ;;  %s3942_s1 = smov 96  }
  0xa3   :  { %650 = vmatmul.mubr.bf16.vlgmr.msra.gmra.mxu0 %v183_v41  ;;  %756 = vmatmul.mubr.bf16.vlgmr.msra.gmra.mxu1 %v183_v41 }
  0xa4   :  { %3427 = vmatpush3.bf16.msra.mxu1 %v3637_v25  ;;  %659 = vmatprep.mubr.bf16.mxu0 %v193_v40 }
  0xa5   :  { %3428 = vmatprep.subr.bf16.mxu1 %v3638_v39  ;;  %763 = vmatprep.mubr.bf16.mxu1 %v193_v40 }
  0xa8   :  { %3429 = vmatpush3.bf16.msra.mxu1 %v3638_v39 }
  0xa9   :  { %3430 = vmatprep.subr.bf16.mxu1 %v3639_v43 }
  0xab   :  { %660 = vmatmul.mubr.bf16.gmra.mxu0 %v186_v44  ;;  %764 = vmatmul.mubr.bf16.gmra.mxu1 %v186_v44 }
  0xac   :  { %3431 = vmatpush3.bf16.msra.mxu1 %v3639_v43  ;;  %3434 = vmatprep.mubr.msk.bf16.mxu1 %vm181_vm7, %v4118_v55  ;;  %v280_v55 = vrot.slane %v275_v54, %v279_v53 }
  0xad   :  { %3432 = vmatprep.subr.bf16.mxu1 %v3640_v8 }
  0xb0   :  { %3433 = vmatpush3.bf16.msra.mxu1 %v3640_v8 }
  0xb3   :  { %3435 = vmatmul.mubr.msk.bf16.vlgmr.msra.gmra.mxu1 %vm181_vm7, %v4151_v1 }
  0xfb   :  { %v704_v45 = vpop.f32.mrf.mxu1 }
  0xfd   :  { %v706_v46 = vpop.f32.mrf.mxu1 }
  0xff   :  { %v708_v47 = vpop.f32.mrf.mxu1 }
 0x101   :  { %v710_v9 = vpop.f32.mrf.mxu1 }
 0x103   :  { %v714_v48 = vpop.f32.mrf.mxu1 }
 0x105   :  { %v716_v50 = vpop.f32.mrf.mxu1 }
 0x107   :  { %v718_v52 = vpop.f32.mrf.mxu1 }
 0x109   :  { %v720_v56 = vpop.f32.mrf.mxu1 }
 0x163   :  { %v651_v58 = vpop.f32.mrf.mxu0  ;;  %v3274_v59 = vpop.f32.mrf.mxu1 }
 0x164   :  { %v652_v60 = vadd.f32 %v651_v58, %v280_v55 }
 0x165   :  { %v653_v62 = vpop.f32.mrf.mxu0  ;;  %v3275_v63 = vpop.f32.mrf.mxu1 }
 0x166   :  { %v705_v3 = vadd.f32 %v704_v45, %v652_v60  ;;  %v654_v4 = vadd.f32 %v653_v62, %v284_v61  ;;  %v3276_v24 = vadd.f32 %v3275_v63, %v3274_v59 }
 0x167   :  { %v655_v0 = vpop.f32.mrf.mxu0  ;;  %v3277_v1 = vpop.f32.mrf.mxu1 }
 0x168   :  { %v656_v2 = vadd.f32 %v655_v0, %v280_v55  ;;  %v821_v17 = vmax.f32 %v705_v3, 0.0  ;;  %v4267_v18 = vadd.f32 %v706_v46, %v654_v4  ;;  %v758_v46 = vadd.f32 %v3276_v24, %v288_v29 }
 0x169   :  { %v657_v5 = vpop.f32.mrf.mxu0  ;;  %v3278_v6 = vpop.f32.mrf.mxu1 }
 0x16a   :  { %v709_v7 = vadd.f32 %v708_v47, %v656_v2  ;;  %v658_v10 = vadd.f32 %v657_v5, %v284_v61  ;;  %v845_v34 = vrot.slane %v821_v17, 1  ;;  %v822_v35 = vmax.f32 %v4267_v18, 0.0 }
 0x16b   :  { %v661_v11 = vpop.f32.mrf.mxu0  ;;  %v3280_v12 = vpop.f32.mrf.mxu1  ;;  %v3279_v44 = vadd.f32 %v3278_v6, %v3277_v1 }
 0x16c   :  { %v824_v14 = vmax.f32 %v709_v7, 0.0  ;;  %v4265_v15 = vadd.f32 %v710_v9, %v658_v10  ;;  %v662_v16 = vadd.f32 %v661_v11, %v280_v55 }
 0x16d   :  { %v663_v19 = vpop.f32.mrf.mxu0  ;;  %v3281_v20 = vpop.f32.mrf.mxu1  ;;  %v761_v63 = vadd.f32 %v3279_v44, %v288_v29 }
 0x16e   :  { %v715_v22 = vadd.f32 %v714_v48, %v662_v16  ;;  %v664_v23 = vadd.f32 %v663_v19, %v284_v61  ;;  %v825_v25 = vmax.f32 %v4265_v15, 0.0  ;;  %v3282_v26 = vadd.f32 %v3281_v20, %v3280_v12 }
 0x16f   :  { %v665_v27 = vpop.f32.mrf.mxu0  ;;  %v3283_v28 = vpop.f32.mrf.mxu1  ;;  %v846_v30 = vrot.slane %v824_v14, 1 }
 0x170   :  { %v827_v31 = vmax.f32 %v715_v22, 0.0  ;;  %v717_v32 = vadd.f32 %v716_v50, %v664_v23  ;;  %v666_v33 = vadd.f32 %v665_v27, %v280_v55  ;;  %v766_v38 = vadd.f32 %v3282_v26, %v288_v29 }
 0x171   :  { %v667_v36 = vpop.f32.mrf.mxu0  ;;  %v3284_v37 = vpop.f32.mrf.mxu1  ;;  %v849_v43 = vrot.slane %v825_v25, 1  ;;  %v847_v49 = vsel %vm145_vm2, %v845_v34, %v846_v30  ;;  %v848_v50 = vrot.slane %v822_v35, 1 }
 0x172   :  { %v854_v39 = vrot.slane %v827_v31, 1  ;;  %v828_v40 = vmax.f32 %v717_v32, 0.0  ;;  %v719_v41 = vadd.f32 %v718_v52, %v666_v33  ;;  %v668_v42 = vadd.f32 %v667_v36, %v284_v61 }
 0x173   :  { %v3285_v8 = vadd.f32 %v3284_v37, %v3283_v28  ;;  %v3436_v45 = vpop.f32.mrf.mxu1  ;;  %v881_v0 = vmax.f32 %v821_v17, %v847_v49  ;;  %v850_v1 = vsel %vm145_vm2, %v848_v50, %v849_v43 }
 0x174   :  { %v830_v47 = vmax.f32 %v719_v41, 0.0  ;;  %v721_v9 = vadd.f32 %v720_v56, %v668_v42  ;;  %v815_v48 = vadd.f32 %v3436_v45, %v766_v38  ;;  %v856_v54 = vrot.slane %v828_v40, 1 }
 0x175   :  { %v806_v55 = vpop.f32.mrf.mxu1  ;;  %v855_v58 = vsel %vm145_vm2, %v846_v30, %v854_v39  ;;  %v769_v61 = vadd.f32 %v3285_v8, %v288_v29 }
 0x176   :  { %v860_v59 = vrot.slane %v830_v47, 1  ;;  %v831_v52 = vmax.f32 %v721_v9, 0.0  ;;  %v807_v60 = vadd.f32 %v806_v55, %v758_v46  ;;  %v829_v3 = vmax.f32 %v815_v48, 0.0 }
 0x177   :  { %v3437_v62 = vpop.f32.mrf.mxu1  ;;  %v884_v4 = vmax.f32 %v824_v14, %v855_v58  ;;  %v857_v11 = vsel %vm145_vm2, %v849_v43, %v856_v54 }
 0x178   :  { %v878_v2 = vsel %vm145_vm2, %v860_v59, 0.0  ;;  %v862_v56 = vrot.slane %v831_v52, 1  ;;  %v818_v6 = vadd.f32 %v3437_v62, %v769_v61  ;;  %v861_v10 = vsel %vm145_vm2, %v854_v39, %v860_v59 }
 0x179   :  { %v890_v5 = vmax.f32 %v830_v47, %v878_v2  ;;  %v809_v7 = vpop.f32.mrf.mxu1  ;;  %v823_v16 = vmax.f32 %v807_v60, 0.0  ;;  %v887_v19 = vmax.f32 %v827_v31, %v861_v10  ;;  %v858_v27 = vrot.slane %v829_v3, 1 }
 0x17a   :  { %v879_v12 = vsel %vm145_vm2, %v862_v56, 0.0  ;;  %v810_v18 = vadd.f32 %v809_v7, %v761_v63  ;;  %v832_v20 = vmax.f32 %v818_v6, 0.0  ;;  %v863_v23 = vsel %vm145_vm2, %v856_v54, %v862_v56 }
 0x17b   :  { %v891_v17 = vmax.f32 %v831_v52, %v879_v12  ;;  %v3489_v22 = vpack.i.bf16 %v890_v5, %v884_v4  ;;  %v3494_v26 = vpack.i.bf16 %v887_v19, %v881_v0  ;;  %v888_v14 = vmax.f32 %v828_v40, %v863_v23 }
 0x17c   :  { %v826_v24 = vmax.f32 %v810_v18, 0.0  ;;  %v864_v28 = vrot.slane %v832_v20, 1  ;;  %v885_v29 = vmax.f32 %v825_v25, %v857_v11  ;;  %v851_v30 = vrot.slane %v823_v16, 1 }
 0x17d   :  { %3490 = vrot.lane.b32.xlu0 %v3489_v22, %s3942_s1  ;;  %3495 = vrot.lane.b32.xlu1 %v3494_v26, %s3942_s1  ;;  %v882_v31 = vmax.f32 %v822_v35, %v850_v1  ;;  %v1035_v26 = vadd.s32 24, %v4256_v51 }
 0x17e   :  { %v852_v32 = vrot.slane %v826_v24, 1  ;;  %v880_v33 = vsel %vm145_vm2, %v864_v28, 0.0  ;;  %v3499_v34 = vpack.i.bf16 %v891_v17, %v885_v29  ;;  %v865_v36 = vsel %vm145_vm2, %v858_v27, %v864_v28 }
 0x17f   :  { %v3504_v38 = vpack.i.bf16 %v888_v14, %v882_v31  ;;  %v892_v40 = vmax.f32 %v832_v20, %v880_v33  ;;  %v889_v25 = vmax.f32 %v829_v3, %v865_v36  ;;  %v1061_v33 = vand.u32 15, %v1035_v26 }
 0x180   :  { %v859_v37 = vsel %vm145_vm2, %v852_v32, %v858_v27  ;;  %v853_v39 = vsel %vm145_vm2, %v851_v30, %v852_v32 }
 0x181   :  { %v886_v41 = vmax.f32 %v826_v24, %v859_v37  ;;  %3500 = vrot.lane.b32.xlu0 %v3499_v34, %s3942_s1  ;;  %v883_v15 = vmax.f32 %v823_v16, %v853_v39  ;;  %3505 = vrot.lane.b32.xlu1 %v3504_v38, %s3942_s1  ;;  %v1033_v24 = vadd.s32 8, %v4256_v51  ;;  %vm4318_vm11 = vcmp.lt.s32.totalorder %v1061_v33, 12 }
 0x183   :  { %v3509_v42 = vpack.i.bf16 %v892_v40, %v886_v41  ;;  %v3514_v35 = vpack.i.bf16 %v889_v25, %v883_v15 }
 0x185   :  { %3510 = vrot.lane.b32.xlu0 %v3509_v42, %s3942_s1  ;;  %3515 = vrot.lane.b32.xlu1 %v3514_v35, %s3942_s1 }
 0x1ef   :  { %v3491_v43 = vpop.permute.xlu0 %3490  ;;  %v3496_v45 = vpop.permute.xlu1 %3495 }
 0x1f0   :  { %v3493_v44 = vunpack.i.h.bf16 %v3491_v43  ;;  %v3492_v8 = vunpack.i.l.bf16 %v3491_v43  ;;  %v3498_v46 = vunpack.i.h.bf16 %v3496_v45  ;;  %v3497_v47 = vunpack.i.l.bf16 %v3496_v45 }
 0x1f2   :  { %v912_v9 = vmax.f32 %v890_v5, %v3493_v44  ;;  %v910_v48 = vmax.f32 %v884_v4, %v3492_v8  ;;  %v4295_v49 = vmax.f32 %v887_v19, %v3498_v46  ;;  %v4297_v50 = vmax.f32 %v881_v0, %v3497_v47 }
 0x1f3   :  { %v3501_v54 = vpop.permute.xlu0 %3500  ;;  %v3506_v59 = vpop.permute.xlu1 %3505 }
 0x1f4   :  { %v3503_v55 = vunpack.i.h.bf16 %v3501_v54  ;;  %v3502_v58 = vunpack.i.l.bf16 %v3501_v54  ;;  %v3519_v52 = vpack.i.bf16 %v912_v9, %v910_v48  ;;  %v3508_v60 = vunpack.i.h.bf16 %v3506_v59 }
 0x1f5   :  { %v3507_v61 = vunpack.i.l.bf16 %v3506_v59  ;;  %v3524_v62 = vpack.i.bf16 %v4295_v49, %v4297_v50 }
 0x1f6   :  { %v932_v63 = vmax.f32 %v891_v17, %v3503_v55  ;;  %v930_v1 = vmax.f32 %v885_v29, %v3502_v58  ;;  %3520 = vrot.lane.b32.xlu0 %v3519_v52, %s3942_s1  ;;  %v931_v2 = vmax.f32 %v888_v14, %v3508_v60 }
 0x1f7   :  { %v929_v56 = vmax.f32 %v882_v31, %v3507_v61  ;;  %3525 = vrot.lane.b32.xlu1 %v3524_v62, %s3942_s1  ;;  %v3511_v0 = vpop.permute.xlu0 %3510  ;;  %v3516_v5 = vpop.permute.xlu1 %3515  ;;  %v1047_v31 = vand.u32 15, %v1033_v24 }
 0x1f8   :  { %v3513_v3 = vunpack.i.h.bf16 %v3511_v0  ;;  %v3512_v4 = vunpack.i.l.bf16 %v3511_v0  ;;  %v3529_v6 = vpack.i.bf16 %v932_v63, %v930_v1  ;;  %v3518_v7 = vunpack.i.h.bf16 %v3516_v5 }
 0x1f9   :  { %v3517_v10 = vunpack.i.l.bf16 %v3516_v5  ;;  %v3534_v11 = vpack.i.bf16 %v931_v2, %v929_v56  ;;  %vm4313_vm10 = vcmp.lt.s32.totalorder %v1047_v31, 12 }
 0x1fa   :  { %v952_v12 = vmax.f32 %v892_v40, %v3513_v3  ;;  %v950_v16 = vmax.f32 %v886_v41, %v3512_v4  ;;  %3530 = vrot.lane.b32.xlu0 %v3529_v6, %s3941_s15  ;;  %v951_v19 = vmax.f32 %v889_v25, %v3518_v7 }
 0x1fb   :  { %3535 = vrot.lane.b32.xlu1 %v3534_v11, %s3941_s15  ;;  %v949_v17 = vmax.f32 %v883_v15, %v3517_v10 }
 0x1fc   :  { %v3549_v18 = vpack.i.bf16 %v952_v12, %v950_v16 }
 0x1fd   :  { %v3554_v20 = vpack.i.bf16 %v951_v19, %v949_v17 }
 0x1fe   :  { %3540 = vrot.lane.b32.xlu0 %v3529_v6, %s3943_s10 }
 0x1ff   :  { %3550 = vrot.lane.b32.xlu1 %v3549_v18, %s3942_s1 }
 0x202   :  { %3545 = vrot.lane.b32.xlu0 %v3534_v11, %s3943_s10 }
 0x203   :  { %3555 = vrot.lane.b32.xlu1 %v3554_v20, %s3942_s1 }
 0x268   :  { %v3521_v22 = vpop.permute.xlu0 %3520 }
 0x269   :  { %v3526_v23 = vpop.permute.xlu1 %3525  ;;  %v3523_v14 = vunpack.i.h.bf16 %v3521_v22  ;;  %v3522_v27 = vunpack.i.l.bf16 %v3521_v22 }
 0x26a   :  { %v3528_v37 = vunpack.i.h.bf16 %v3526_v23  ;;  %v3527_v38 = vunpack.i.l.bf16 %v3526_v23 }
 0x26b   :  { %v1017_v34 = vsel %vm1013_vm8, %v912_v9, %v3523_v14  ;;  %v1015_v36 = vsel %vm1013_vm8, %v910_v48, %v3522_v27 }
 0x26c   :  { %v3531_v28 = vpop.permute.xlu0 %3530  ;;  %v1016_v48 = vsel %vm1013_vm8, %v4295_v49, %v3528_v37  ;;  %v1014_v54 = vsel %vm1013_vm8, %v4297_v50, %v3527_v38 }
 0x26d   :  { %v3536_v29 = vpop.permute.xlu1 %3535  ;;  %v3533_v30 = vunpack.i.h.bf16 %v3531_v28  ;;  %v3532_v32 = vunpack.i.l.bf16 %v3531_v28 }
 0x26e   :  { %v3538_v40 = vunpack.i.h.bf16 %v3536_v29  ;;  %v3537_v41 = vunpack.i.l.bf16 %v3536_v29 }
 0x26f   :  { %v1019_v35 = vsel %vm181_vm7, %v1015_v36, %v3532_v32  ;;  %v1021_v43 = vsel %vm181_vm7, %v1017_v34, %v3533_v30 }
 0x270   :  { %v3541_v39 = vpop.permute.xlu0 %3540  ;;  %v1018_v52 = vsel %vm181_vm7, %v1014_v54, %v3537_v41  ;;  %v1020_v60 = vsel %vm181_vm7, %v1016_v48, %v3538_v40 }
 0x271   :  { %v3543_v15 = vunpack.i.h.bf16 %v3541_v39  ;;  %v3542_v25 = vunpack.i.l.bf16 %v3541_v39  ;;  %v3551_v42 = vpop.permute.xlu1 %3550 }
 0x272   :  { %v3553_v44 = vunpack.i.h.bf16 %v3551_v42  ;;  %v3552_v8 = vunpack.i.l.bf16 %v3551_v42 }
 0x273   :  { %v1024_v46 = vsel %vm1022_vm9, %v1019_v35, %v3542_v25  ;;  %v1026_v9 = vsel %vm1022_vm9, %v1021_v43, %v3543_v15 }
 0x274   :  { %v3546_v55 = vpop.permute.xlu0 %3545  ;;  %v1028_v58 = vsel %vm1013_vm8, %v950_v16, %v3552_v8  ;;  %v1030_v59 = vsel %vm1013_vm8, %v952_v12, %v3553_v44  ;;  %v1090_v49 = vsel %vm4313_vm10, %v1024_v46, 0.0  ;;  %v1094_v50 = vsel %vm4318_vm11, %v1026_v9, 0.0 }
 0x275   :  { %v3548_v61 = vunpack.i.h.bf16 %v3546_v55  ;;  %v3547_v62 = vunpack.i.l.bf16 %v3546_v55  ;;  %v3556_v63 = vpop.permute.xlu1 %3555  ;;  %v1091_v56 = vsel %vm4313_vm10, %v1028_v58, 0.0  ;;  %v1095_v3 = vsel %vm4318_vm11, %v1030_v59, 0.0 }
 0x276   :  { %v3558_v1 = vunpack.i.h.bf16 %v3556_v63  ;;  %v3557_v2 = vunpack.i.l.bf16 %v3556_v63 }
 0x277   :  { %v1023_v0 = vsel %vm1022_vm9, %v1018_v52, %v3547_v62  ;;  %v1025_v4 = vsel %vm1022_vm9, %v1020_v60, %v3548_v61 }
 0x278   :  { %v1027_v5 = vsel %vm1013_vm8, %v949_v17, %v3557_v2  ;;  %v1096_v6 = vpack.c.bf16 %v1090_v49, %v1023_v0  ;;  %v1029_v7 = vsel %vm1013_vm8, %v951_v19, %v3558_v1  ;;  %v1098_v10 = vpack.c.bf16 %v1094_v50, %v1025_v4 }
 0x279   :  { %v1097_v11 = vpack.c.bf16 %v1091_v56, %v1027_v5  ;;  %v1099_v12 = vpack.c.bf16 %v1095_v3, %v1029_v7 }
 0x27a   :  { %1130 = vrot.lane.b32.xlu0 %v1096_v6, %s3941_s15  ;;  %v4344_v16 = vrot.slane %v1096_v6, 7  ;;  %v1118_v18 = vrot.slane %v1096_v6, 1  ;;  %v1107_v20 = vrot.slane %v1098_v10, 7  ;;  %v4346_v22 = vrot.slane %v1098_v10, 1 }
 0x27b   :  { %1132 = vrot.lane.b32.xlu1 %v1097_v11, %s3941_s15  ;;  %v1121_v23 = vrot.slane %v1097_v11, 1  ;;  %v1122_v24 = vrot.slane %v1099_v12, 1  ;;  %v1106_v17 = vrot.slane %v1097_v11, 7  ;;  %v1109_v26 = vrot.slane %v1099_v12, 7 }
 0x27c   :  { %v4351_v19 = vsel %vm145_vm2, %v1118_v18, %v4346_v22  ;;  %v4355_v14 = vsel %vm1104_vm12, %v4344_v16, %v1107_v20 }
 0x27d   :  { %v4358_v27 = vsel %vm145_vm2, %v1122_v24, 0  ;;  %v4361_v28 = vsel %vm145_vm2, %v1121_v23, %v1122_v24  ;;  %v1110_v29 = vsel %vm1104_vm12, %v1106_v17, %v1109_v26  ;;  %v1117_v30 = vsel %vm1104_vm12, 0, %v1106_v17 }
 0x27e   :  { %1134 = vrot.lane.b32.xlu0 %v1098_v10, %s3941_s15 }
 0x27f   :  { %1136 = vrot.lane.b32.xlu1 %v1099_v12, %s3941_s15 }
 0x2ec   :  { %v1131_v32 = vpop.permute.xlu0 %1130 }
 0x2ed   :  { %v1133_v31 = vpop.permute.xlu1 %1132  ;;  %v4368_v33 = vsel %vm181_vm7, %v1117_v30, %v1131_v32 }
 0x2ee   :  { %v4371_v34 = vsel %vm181_vm7, %v1131_v32, %v1133_v31 }
 0x2f0   :  { %v1135_v36 = vpop.permute.xlu0 %1134 }
 0x2f1   :  { %v1137_v37 = vpop.permute.xlu1 %1136  ;;  %v4374_v38 = vsel %vm181_vm7, %v1110_v29, %v1135_v36 }
 0x2f2   :  { %v4377_v39 = vsel %vm181_vm7, %v1135_v36, %v1137_v37 }
 0x2f3   :  { %3931 = dma.done.wait [#allocation5], 13824 }
 0x2f4   :  { %3932 = vsyncadd [#allocation5], 4294953472  ;;  %1929 = vmatprep.mubr.bf16.mxu0 %v4368_v33  ;;  %1982 = vmatprep.mubr.bf16.mxu1 %v4351_v19  ;;  %v3681_v40 = vld [vmem:[#allocation2 + $0xac] ss:$12 sps:$4 sm:$0xff]   ;;  %v3683_v41 = vld [vmem:[#allocation2 + $0xa8] ss:$12 sps:$4 sm:$0xff]  }
 0x2f5   :  { %1897 = vmatprep.subr.bf16.mxu0 %v3681_v40  ;;  %v3684_v15 = vld [vmem:[#allocation2 + $0x22c] ss:$12 sps:$4 sm:$0xff]   ;;  %v3686_v25 = vld [vmem:[#allocation2 + $0x228] ss:$12 sps:$4 sm:$0xff]   ;;  %v3689_v35 = vld [vmem:[#allocation2 + $0x90] ss:$12 sps:$4 sm:$0xff]  }
 0x2f6   :  { %1898 = vmatpush1.bf16.msra.mxu0 %v3683_v41  ;;  %v3687_v42 = vld [vmem:[#allocation2 + $0x94] ss:$12 sps:$4 sm:$0xff]   ;;  %1950 = vmatprep.subr.bf16.mxu1 %v3684_v15  ;;  %v3692_v44 = vld [vmem:[#allocation2 + $0x210] ss:$12 sps:$4 sm:$0xff]   ;;  %v3695_v45 = vld [vmem:[#allocation2 + $0x78] ss:$12 sps:$4 sm:$0xff]  }
 0x2f7   :  { %v3690_v43 = vld [vmem:[#allocation2 + $0x214] ss:$12 sps:$4 sm:$0xff]   ;;  %1951 = vmatpush1.bf16.msra.mxu1 %v3686_v25  ;;  %1899 = vmatprep.subr.bf16.mxu0 %v3687_v42  ;;  %v3693_v8 = vld [vmem:[#allocation2 + $0x7c] ss:$12 sps:$4 sm:$0xff]   ;;  %v3699_v47 = vld [vmem:[#allocation2 + $0x64] ss:$12 sps:$4 sm:$0xff]  }
 0x2f8   :  { %1952 = vmatprep.subr.bf16.mxu1 %v3690_v43  ;;  %v3696_v46 = vld [vmem:[#allocation2 + $0x1fc] ss:$12 sps:$4 sm:$0xff]   ;;  %v3698_v9 = vld [vmem:[#allocation2 + $0x1f8] ss:$12 sps:$4 sm:$0xff]   ;;  %v3701_v54 = vld [vmem:[#allocation2 + $0x60] ss:$12 sps:$4 sm:$0xff]  }
 0x2f9   :  { %v3702_v48 = vld [vmem:[#allocation2 + $0x1e4] ss:$12 sps:$4 sm:$0xff]   ;;  %v3705_v55 = vld [vmem:[#allocation2 + $0x4c] ss:$12 sps:$4 sm:$0xff]   ;;  %v3707_v52 = vld [vmem:[#allocation2 + $0x48] ss:$12 sps:$4 sm:$0xff]  }
 0x2fa   :  { %1900 = vmatpush1.bf16.msra.mxu0 %v3689_v35  ;;  %v3704_v58 = vld [vmem:[#allocation2 + $0x1e0] ss:$12 sps:$4 sm:$0xff]   ;;  %v3710_v61 = vld [vmem:[#allocation2 + $0x1c8] ss:$12 sps:$4 sm:$0xff]   ;;  %v3713_v63 = vld [vmem:[#allocation2 + $0x30] ss:$12 sps:$4 sm:$0xff]  }
 0x2fb   :  { %1901 = vmatprep.subr.bf16.mxu0 %v3693_v8  ;;  %1953 = vmatpush1.bf16.msra.mxu1 %v3692_v44  ;;  %v3708_v59 = vld [vmem:[#allocation2 + $0x1cc] ss:$12 sps:$4 sm:$0xff]   ;;  %v3711_v60 = vld [vmem:[#allocation2 + $0x34] ss:$12 sps:$4 sm:$0xff]   ;;  %v3717_v1 = vld [vmem:[#allocation2 + $0x1c] ss:$12 sps:$4 sm:$0xff]  }
 0x2fc   :  { %1954 = vmatprep.subr.bf16.mxu1 %v3696_v46  ;;  %v3714_v62 = vld [vmem:[#allocation2 + $0x1b4] ss:$12 sps:$4 sm:$0xff]   ;;  %v3716_v2 = vld [vmem:[#allocation2 + $0x1b0] ss:$12 sps:$4 sm:$0xff]   ;;  %v3719_v50 = vld [vmem:[#allocation2 + $0x18] ss:$12 sps:$4 sm:$0xff]  }
 0x2fd   :  { %v3720_v49 = vld [vmem:[#allocation2 + $0x19c] ss:$12 sps:$4 sm:$0xff]   ;;  %v3723_v56 = vld [vmem:[#allocation2 + $0x4] ss:$12 sps:$4 sm:$0xff]   ;;  %v3725_v4 = vld [vmem:[#allocation2] ss:$12 sps:$4 sm:$0xff]  }
 0x2fe   :  { %1902 = vmatpush1.bf16.msra.mxu0 %v3695_v45  ;;  %v3722_v0 = vld [vmem:[#allocation2 + $0x198] ss:$12 sps:$4 sm:$0xff]   ;;  %v3728_v6 = vld [vmem:[#allocation2 + $0x180] ss:$12 sps:$4 sm:$0xff]   ;;  %v3731_v10 = vld [vmem:[#allocation2 + $0x168] ss:$12 sps:$4 sm:$0xff]  }
 0x2ff   :  { %1903 = vmatprep.subr.bf16.mxu0 %v3699_v47  ;;  %1955 = vmatpush1.bf16.msra.mxu1 %v3698_v9  ;;  %v3726_v3 = vld [vmem:[#allocation2 + $0x184] ss:$12 sps:$4 sm:$0xff]   ;;  %v3729_v5 = vld [vmem:[#allocation2 + $0x16c] ss:$12 sps:$4 sm:$0xff]   ;;  %v3735_v11 = vld [vmem:[#allocation2 + $0x154] ss:$12 sps:$4 sm:$0xff]  }
 0x300   :  { %1956 = vmatprep.subr.bf16.mxu1 %v3702_v48  ;;  %v3732_v7 = vld [vmem:[#allocation2 + $0x2ec] ss:$12 sps:$4 sm:$0xff]   ;;  %v3734_v12 = vld [vmem:[#allocation2 + $0x2e8] ss:$12 sps:$4 sm:$0xff]   ;;  %v3737_v20 = vld [vmem:[#allocation2 + $0x150] ss:$12 sps:$4 sm:$0xff]  }
 0x301   :  { %v3738_v18 = vld [vmem:[#allocation2 + $0x2d4] ss:$12 sps:$4 sm:$0xff]   ;;  %v3741_v23 = vld [vmem:[#allocation2 + $0x13c] ss:$12 sps:$4 sm:$0xff]   ;;  %v3743_v26 = vld [vmem:[#allocation2 + $0x138] ss:$12 sps:$4 sm:$0xff]  }
 0x302   :  { %1904 = vmatpush1.bf16.msra.mxu0 %v3701_v54  ;;  %v3740_v24 = vld [vmem:[#allocation2 + $0x2d0] ss:$12 sps:$4 sm:$0xff]   ;;  %v3746_v30 = vld [vmem:[#allocation2 + $0x2b8] ss:$12 sps:$4 sm:$0xff]   ;;  %v3749_v31 = vld [vmem:[#allocation2 + $0x120] ss:$12 sps:$4 sm:$0xff]  }
 0x303   :  { %1905 = vmatprep.subr.bf16.mxu0 %v3705_v55  ;;  %1957 = vmatpush1.bf16.msra.mxu1 %v3704_v58  ;;  %v3744_v17 = vld [vmem:[#allocation2 + $0x2bc] ss:$12 sps:$4 sm:$0xff]   ;;  %v3747_v29 = vld [vmem:[#allocation2 + $0x124] ss:$12 sps:$4 sm:$0xff]   ;;  %v3753_v36 = vld [vmem:[#allocation2 + $0x10c] ss:$12 sps:$4 sm:$0xff]  }
 0x304   :  { %1958 = vmatprep.subr.bf16.mxu1 %v3708_v59  ;;  %v3750_v32 = vld [vmem:[#allocation2 + $0x2a4] ss:$12 sps:$4 sm:$0xff]   ;;  %v3752_v37 = vld [vmem:[#allocation2 + $0x2a0] ss:$12 sps:$4 sm:$0xff]   ;;  %v3755_v41 = vld [vmem:[#allocation2 + $0x108] ss:$12 sps:$4 sm:$0xff]  }
 0x305   :  { %v3756_v40 = vld [vmem:[#allocation2 + $0x28c] ss:$12 sps:$4 sm:$0xff]   ;;  %v3759_v15 = vld [vmem:[#allocation2 + $0xf4] ss:$12 sps:$4 sm:$0xff]   ;;  %v3761_v35 = vld [vmem:[#allocation2 + $0xf0] ss:$12 sps:$4 sm:$0xff]  }
 0x306   :  { %1906 = vmatpush1.bf16.msra.mxu0 %v3707_v52  ;;  %v3758_v25 = vld [vmem:[#allocation2 + $0x288] ss:$12 sps:$4 sm:$0xff]   ;;  %v3764_v44 = vld [vmem:[#allocation2 + $0x270] ss:$12 sps:$4 sm:$0xff]   ;;  %v3767_v45 = vld [vmem:[#allocation2 + $0xd8] ss:$12 sps:$4 sm:$0xff]  }
 0x307   :  { %1907 = vmatprep.subr.bf16.mxu0 %v3711_v60  ;;  %1959 = vmatpush1.bf16.msra.mxu1 %v3710_v61  ;;  %v3762_v42 = vld [vmem:[#allocation2 + $0x274] ss:$12 sps:$4 sm:$0xff]   ;;  %v3765_v43 = vld [vmem:[#allocation2 + $0xdc] ss:$12 sps:$4 sm:$0xff]   ;;  %vm4382_vm13 = vmneg %vm1104_vm12  ;;  %vm2373_vm14 = vcmask 1043456  }
 0x308   :  { %1960 = vmatprep.subr.bf16.mxu1 %v3714_v62  ;;  %v3768_v8 = vld [vmem:[#allocation2 + $0x25c] ss:$12 sps:$4 sm:$0xff]   ;;  %v3771_v47 = vld [vmem:[#allocation2 + $0xc4] ss:$12 sps:$4 sm:$0xff]   ;;  %v3773_v54 = vld [vmem:[#allocation2 + $0xc0] ss:$12 sps:$4 sm:$0xff]  }
 0x309   :  { %v3770_v9 = vld [vmem:[#allocation2 + $0x258] ss:$12 sps:$4 sm:$0xff]   ;;  %v3776_v58 = vld [vmem:[#allocation2 + $0x240] ss:$12 sps:$4 sm:$0xff]   ;;  %v3786_v59 = vld [vmem:[#allocation2 + $0x170] ss:$12 sps:$4 sm:$0xff]  }
 0x30a   :  { %1908 = vmatpush1.bf16.msra.mxu0 %v3713_v63  ;;  %v3774_v48 = vld [vmem:[#allocation2 + $0x244] ss:$12 sps:$4 sm:$0xff]   ;;  %v3779_v55 = vld [vmem:[#allocation2 + $0x34c] ss:$12 sps:$4 sm:$0xff]   ;;  %v3777_v52 = vld [vmem:[#allocation2 + $0x348] ss:$12 sps:$4 sm:$0xff]  }
 0x30b   :  { %1909 = vmatprep.subr.bf16.mxu0 %v3717_v1  ;;  %1961 = vmatpush1.bf16.msra.mxu1 %v3716_v2  ;;  %v3782_v60 = vld [vmem:[#allocation2 + $0x334] ss:$12 sps:$4 sm:$0xff]   ;;  %v3787_v61 = vld [vmem:[#allocation2 + $0xb0] ss:$12 sps:$4 sm:$0xff]   ;;  %v3791_v62 = vld [vmem:[#allocation2 + $0x158] ss:$12 sps:$4 sm:$0xff]  }
 0x30c   :  { %1962 = vmatprep.subr.bf16.mxu1 %v3720_v49  ;;  %v3780_v63 = vld [vmem:[#allocation2 + $0x330] ss:$12 sps:$4 sm:$0xff]   ;;  %v3792_v2 = vld [vmem:[#allocation2 + $0x98] ss:$12 sps:$4 sm:$0xff]   ;;  %v3793_v49 = vld [vmem:[#allocation2 + $0x140] ss:$12 sps:$4 sm:$0xff]  }
 0x30d   :  { %v3785_v1 = vld [vmem:[#allocation2 + $0x31c] ss:$12 sps:$4 sm:$0xff]  }
 0x30e   :  { %1910 = vmatpush1.bf16.msra.mxu0 %v3719_v50  ;;  %v3783_v50 = vld [vmem:[#allocation2 + $0x318] ss:$12 sps:$4 sm:$0xff]  }
 0x30f   :  { %1911 = vmatprep.subr.bf16.mxu0 %v3723_v56  ;;  %1963 = vmatpush1.bf16.msra.mxu1 %v3722_v0  ;;  %v3790_v56 = vld [vmem:[#allocation2 + $0x304] ss:$12 sps:$4 sm:$0xff]   ;;  %v3795_v0 = vld [vmem:[#allocation2 + $0x80] ss:$12 sps:$4 sm:$0xff]  }
 0x310   :  { %1964 = vmatprep.subr.bf16.mxu1 %v3726_v3  ;;  %v3797_v3 = vld [vmem:[#allocation2 + $0x128] ss:$12 sps:$4 sm:$0xff]  }
 0x311   :  { %v4416_v46 = vld [vmem:[#allocation6 + $0x1] ss:$4 sm:$0x7] }
 0x312   :  { %1912 = vmatpush1.bf16.msra.mxu0 %v3725_v4  ;;  %v3788_v4 = vld [vmem:[#allocation2 + $0x300] ss:$12 sps:$4 sm:$0xff]  }
 0x313   :  { %1913 = vmatprep.subr.bf16.mxu0 %v3729_v5  ;;  %1965 = vmatpush1.bf16.msra.mxu1 %v3728_v6  ;;  %v3794_v5 = vld [vmem:[#allocation2 + $0x2f0] ss:$12 sps:$4 sm:$0xff]   ;;  %v3799_v6 = vld [vmem:[#allocation2 + $0x68] ss:$12 sps:$4 sm:$0xff]  }
 0x314   :  { %1966 = vmatprep.subr.bf16.mxu1 %v3732_v7  ;;  %v3801_v7 = vld [vmem:[#allocation2 + $0x110] ss:$12 sps:$4 sm:$0xff]  }
 0x316   :  { %1914 = vmatpush2.bf16.msra.mxu0 %v3731_v10  ;;  %v3796_v10 = vld [vmem:[#allocation2 + $0x230] ss:$12 sps:$4 sm:$0xff]  }
 0x317   :  { %1915 = vmatprep.subr.bf16.mxu0 %v3735_v11  ;;  %1967 = vmatpush2.bf16.msra.mxu1 %v3734_v12  ;;  %v3798_v11 = vld [vmem:[#allocation2 + $0x2d8] ss:$12 sps:$4 sm:$0xff]   ;;  %v3803_v12 = vld [vmem:[#allocation2 + $0x50] ss:$12 sps:$4 sm:$0xff]  }
 0x318   :  { %1968 = vmatprep.subr.bf16.mxu1 %v3738_v18  ;;  %v3805_v18 = vld [vmem:[#allocation2 + $0xf8] ss:$12 sps:$4 sm:$0xff]  }
 0x31a   :  { %1916 = vmatpush2.bf16.msra.mxu0 %v3737_v20  ;;  %v3800_v20 = vld [vmem:[#allocation2 + $0x218] ss:$12 sps:$4 sm:$0xff]  }
 0x31b   :  { %1917 = vmatprep.subr.bf16.mxu0 %v3741_v23  ;;  %1969 = vmatpush2.bf16.msra.mxu1 %v3740_v24  ;;  %v3802_v23 = vld [vmem:[#allocation2 + $0x2c0] ss:$12 sps:$4 sm:$0xff]  }
 0x31c   :  { %1970 = vmatprep.subr.bf16.mxu1 %v3744_v17  ;;  %v3809_v24 = vld [vmem:[#allocation2 + $0xe0] ss:$12 sps:$4 sm:$0xff]  }
 0x31d   :  { %v3804_v17 = vld [vmem:[#allocation2 + $0x200] ss:$12 sps:$4 sm:$0xff]  }
 0x31e   :  { %1918 = vmatpush2.bf16.msra.mxu0 %v3743_v26  ;;  %v3806_v26 = vld [vmem:[#allocation2 + $0x2a8] ss:$12 sps:$4 sm:$0xff]  }
 0x31f   :  { %1919 = vmatprep.subr.bf16.mxu0 %v3747_v29  ;;  %1971 = vmatpush2.bf16.msra.mxu1 %v3746_v30  ;;  %v3811_v29 = vld [vmem:[#allocation2 + $0x20] ss:$12 sps:$4 sm:$0xff]   ;;  %v3813_v30 = vld [vmem:[#allocation2 + $0xc8] ss:$12 sps:$4 sm:$0xff]  }
 0x320   :  { %1972 = vmatprep.subr.bf16.mxu1 %v3750_v32  ;;  %v3808_v32 = vld [vmem:[#allocation2 + $0x1e8] ss:$12 sps:$4 sm:$0xff]  }
 0x322   :  { %1920 = vmatpush2.bf16.msra.mxu0 %v3749_v31  ;;  %v3815_v31 = vld [vmem:[#allocation2 + $0x8] ss:$12 sps:$4 sm:$0xff]  }
 0x323   :  { %1921 = vmatprep.subr.bf16.mxu0 %v3753_v36  ;;  %1973 = vmatpush2.bf16.msra.mxu1 %v3752_v37  ;;  %v3818_v36 = vld [vmem:[#allocation2 + $0x350] ss:$12 sps:$4 sm:$0xff]  }
 0x324   :  { %1974 = vmatprep.subr.bf16.mxu1 %v3756_v40  ;;  %v3812_v37 = vld [vmem:[#allocation2 + $0x1d0] ss:$12 sps:$4 sm:$0xff]   ;;  %v3814_v40 = vld [vmem:[#allocation2 + $0x278] ss:$12 sps:$4 sm:$0xff]  }
 0x326   :  { %1922 = vmatpush2.bf16.msra.mxu0 %v3755_v41  ;;  %v3821_v41 = vld [vmem:[#allocation2 + $0x338] ss:$12 sps:$4 sm:$0xff]  }
 0x327   :  { %1923 = vmatprep.subr.bf16.mxu0 %v3759_v15  ;;  %1975 = vmatpush2.bf16.msra.mxu1 %v3758_v25  ;;  %v3816_v15 = vld [vmem:[#allocation2 + $0x1b8] ss:$12 sps:$4 sm:$0xff]   ;;  %v3823_v25 = vld [vmem:[#allocation2 + $0x320] ss:$12 sps:$4 sm:$0xff]  }
 0x328   :  { %1976 = vmatprep.subr.bf16.mxu1 %v3762_v42  ;;  %v3819_v42 = vld [vmem:[#allocation2 + $0x1a0] ss:$12 sps:$4 sm:$0xff]  }
 0x32a   :  { %1924 = vmatpush2.bf16.msra.mxu0 %v3761_v35  ;;  %v3820_v35 = vld [vmem:[#allocation2 + $0x248] ss:$12 sps:$4 sm:$0xff]  }
 0x32b   :  { %1925 = vmatprep.subr.bf16.mxu0 %v3765_v43  ;;  %1977 = vmatpush2.bf16.msra.mxu1 %v3764_v44  ;;  %v3824_v43 = vld [vmem:[#allocation2 + $0x308] ss:$12 sps:$4 sm:$0xff]  }
 0x32c   :  { %1978 = vmatprep.subr.bf16.mxu1 %v3768_v8  ;;  %v3822_v44 = vld [vmem:[#allocation2 + $0x188] ss:$12 sps:$4 sm:$0xff]  }
 0x32e   :  { %1926 = vmatpush2.bf16.msra.mxu0 %v3767_v45 }
 0x32f   :  { %1927 = vmatprep.subr.bf16.mxu0 %v3771_v47  ;;  %1979 = vmatpush2.bf16.msra.mxu1 %v3770_v9 }
 0x330   :  { %1980 = vmatprep.subr.bf16.mxu1 %v3774_v48 }
 0x332   :  { %1928 = vmatpush2.bf16.msra.mxu0 %v3773_v54 }
 0x333   :  { %2011 = vmatprep.subr.bf16.mxu0 %v3779_v55  ;;  %1981 = vmatpush2.bf16.msra.mxu1 %v3776_v58 }
 0x334   :  { %3292 = vmatprep.subr.bf16.mxu1 %v3786_v59 }
 0x335   :  { %3197 = vmatmul.mubr.msk.bf16.vlgmr.msra.gmra.mxu0 %vm4382_vm13, %v4344_v16 }
 0x336   :  { %2012 = vmatpush1.bf16.msra.mxu0 %v3777_v52  ;;  %1939 = vmatprep.mubr.bf16.mxu0 %v4374_v38 }
 0x337   :  { %1983 = vmatmul.mubr.bf16.vlgmr.msra.gmra.mxu1 %v4371_v34  ;;  %2013 = vmatprep.subr.bf16.mxu0 %v3782_v60 }
 0x338   :  { %3198 = vmatprep.mubr.msk.bf16.mxu1 %vm145_vm2, %v4346_v22  ;;  %3293 = vmatpush3.bf16.msra.mxu1 %v3787_v61 }
 0x339   :  { %3294 = vmatprep.subr.bf16.mxu1 %v3791_v62 }
 0x33a   :  { %2014 = vmatpush1.bf16.msra.mxu0 %v3780_v63 }
 0x33b   :  { %2015 = vmatprep.subr.bf16.mxu0 %v3785_v1 }
 0x33c   :  { %3295 = vmatpush3.bf16.msra.mxu1 %v3792_v2 }
 0x33d   :  { %1940 = vmatmul.mubr.bf16.gmra.mxu0 %v4355_v14  ;;  %3296 = vmatprep.subr.bf16.mxu1 %v3793_v49 }
 0x33e   :  { %2016 = vmatpush1.bf16.msra.mxu0 %v3783_v50  ;;  %2035 = vmatprep.mubr.bf16.mxu0 %v3940_v21 }
 0x33f   :  { %1993 = vmatmul.mubr.bf16.gmra.mxu1 %v4377_v39  ;;  %2017 = vmatprep.subr.bf16.mxu0 %v3790_v56 }
 0x340   :  { %3297 = vmatpush3.bf16.msra.mxu1 %v3795_v0  ;;  %2088 = vmatprep.mubr.bf16.mxu1 %v4368_v33  ;;  %v3807_v33 = vld [vmem:[#allocation2 + $0x38] ss:$12 sps:$4 sm:$0xff]  }
 0x341   :  { %3298 = vmatprep.subr.bf16.mxu1 %v3797_v3 }
 0x342   :  { %2018 = vmatpush1.bf16.msra.mxu0 %v3788_v4 }
 0x343   :  { %3320 = vmatprep.subr.bf16.mxu0 %v3794_v5 }
 0x344   :  { %3299 = vmatpush3.bf16.msra.mxu1 %v3799_v6 }
 0x345   :  { %3199 = vmatmul.mubr.msk.bf16.vlgmr.msra.gmra.mxu0 %vm181_vm7, %v4361_v28  ;;  %3300 = vmatprep.subr.bf16.mxu1 %v3801_v7 }
 0x346   :  { %3321 = vmatpush3.bf16.msra.mxu0 %v3796_v10  ;;  %2045 = vmatprep.mubr.bf16.mxu0 %v3940_v21  ;;  %v3810_v21 = vld [vmem:[#allocation2 + $0x290] ss:$12 sps:$4 sm:$0xff]  }
 0x347   :  { %3322 = vmatprep.subr.bf16.mxu0 %v3798_v11 }
 0x348   :  { %3301 = vmatpush3.bf16.msra.mxu1 %v3803_v12 }
 0x349   :  { %3302 = vmatprep.subr.bf16.mxu1 %v3805_v18 }
 0x34a   :  { %3323 = vmatpush3.bf16.msra.mxu0 %v3800_v20 }
 0x34b   :  { %3324 = vmatprep.subr.bf16.mxu0 %v3802_v23 }
 0x34c   :  { %3303 = vmatpush3.bf16.msra.mxu1 %v3807_v33 }
 0x34d   :  { %3200 = vmatmul.mubr.msk.bf16.gmra.mxu0 %vm181_vm7, %v4358_v27  ;;  %3304 = vmatprep.subr.bf16.mxu1 %v3809_v24 }
 0x34e   :  { %3325 = vmatpush3.bf16.msra.mxu0 %v3804_v17  ;;  %2137 = vmatprep.mubr.bf16.mxu0 %v4351_v19  ;;  %v3817_v19 = vld [vmem:[#allocation2 + $0x260] ss:$12 sps:$4 sm:$0xff]  }
 0x34f   :  { %3326 = vmatprep.subr.bf16.mxu0 %v3806_v26 }
 0x350   :  { %3305 = vmatpush3.bf16.msra.mxu1 %v3811_v29 }
 0x351   :  { %3306 = vmatprep.subr.bf16.mxu1 %v3813_v30 }
 0x352   :  { %3327 = vmatpush3.bf16.msra.mxu0 %v3808_v32 }
 0x353   :  { %3328 = vmatprep.subr.bf16.mxu0 %v3810_v21 }
 0x354   :  { %3307 = vmatpush3.bf16.msra.mxu1 %v3815_v31 }
 0x355   :  { %3438 = vmatprep.subr.bf16.mxu1 %v3818_v36 }
 0x356   :  { %3329 = vmatpush3.bf16.msra.mxu0 %v3812_v37 }
 0x357   :  { %3330 = vmatprep.subr.bf16.mxu0 %v3814_v40  ;;  %3202 = vmatmul.mubr.msk.bf16.vlgmr.msra.gmra.mxu1 %vm4382_vm13, %v4344_v16 }
 0x358   :  { %3439 = vmatpush3.bf16.msra.mxu1 %v3818_v36  ;;  %2096 = vmatprep.mubr.bf16.mxu1 %v4374_v38 }
 0x359   :  { %3440 = vmatprep.subr.bf16.mxu1 %v3821_v41 }
 0x35a   :  { %3331 = vmatpush3.bf16.msra.mxu0 %v3816_v15 }
 0x35b   :  { %3332 = vmatprep.subr.bf16.mxu0 %v3817_v19 }
 0x35c   :  { %3441 = vmatpush3.bf16.msra.mxu1 %v3821_v41 }
 0x35d   :  { %3442 = vmatprep.subr.bf16.mxu1 %v3823_v25 }
 0x35e   :  { %3333 = vmatpush3.bf16.msra.mxu0 %v3819_v42 }
 0x35f   :  { %3334 = vmatprep.subr.bf16.mxu0 %v3820_v35  ;;  %2097 = vmatmul.mubr.bf16.gmra.mxu1 %v4355_v14 }
 0x360   :  { %3443 = vmatpush3.bf16.msra.mxu1 %v3823_v25  ;;  %3446 = vmatprep.mubr.msk.bf16.mxu1 %vm181_vm7, %v4361_v28 }
 0x361   :  { %3444 = vmatprep.subr.bf16.mxu1 %v3824_v43 }
 0x362   :  { %3335 = vmatpush3.bf16.msra.mxu0 %v3822_v44 }
 0x364   :  { %3445 = vmatpush3.bf16.msra.mxu1 %v3824_v43 }
 0x365   :  { %2138 = vmatmul.mubr.bf16.vlgmr.msra.gmra.mxu0 %v4371_v34  ;;  %v1304_v34 = vrot.slane %v4416_v46, %v279_v53 }
 0x366   :  { %3203 = vmatprep.mubr.msk.bf16.mxu0 %vm145_vm2, %v4346_v22 }
 0x367   :  { %3447 = vmatmul.mubr.msk.bf16.vlgmr.msra.gmra.mxu1 %vm181_vm7, %v4358_v27  ;;  %v1308_v27 = vrot.slane %v4416_v46, %v283_v57 }
 0x36d   :  { %2146 = vmatmul.mubr.bf16.gmra.mxu0 %v4377_v39 }
 0x3f5   :  { %v1931_v16 = vpop.f32.mrf.mxu0 }
 0x3f6   :  { %v1932_v54 = vadd.f32 %v1931_v16, %v1304_v34 }
 0x3f7   :  { %v1933_v38 = vpop.f32.mrf.mxu0  ;;  %v1984_v14 = vpop.f32.mrf.mxu1 }
 0x3f8   :  { %v1934_v58 = vadd.f32 %v1933_v38, %v1308_v27  ;;  %v1985_v61 = vadd.f32 %v1984_v14, %v1932_v54 }
 0x3f9   :  { %v1935_v8 = vpop.f32.mrf.mxu0  ;;  %v1986_v45 = vpop.f32.mrf.mxu1 }
 0x3fa   :  { %v1936_v52 = vadd.f32 %v1935_v8, %v1304_v34  ;;  %v1987_v1 = vadd.f32 %v1986_v45, %v1934_v58 }
 0x3fb   :  { %v1937_v28 = vpop.f32.mrf.mxu0  ;;  %v1988_v47 = vpop.f32.mrf.mxu1 }
 0x3fc   :  { %v1938_v62 = vadd.f32 %v1937_v28, %v1308_v27  ;;  %v1989_v49 = vadd.f32 %v1988_v47, %v1936_v52 }
 0x3fd   :  { %v1941_v9 = vpop.f32.mrf.mxu0  ;;  %v1990_v22 = vpop.f32.mrf.mxu1 }
 0x3fe   :  { %v1942_v53 = vadd.f32 %v1941_v9, %v1304_v34  ;;  %v1991_v3 = vadd.f32 %v1990_v22, %v1938_v62 }
 0x3ff   :  { %v1943_v39 = vpop.f32.mrf.mxu0  ;;  %v1994_v55 = vpop.f32.mrf.mxu1 }
 0x400   :  { %v1944_v57 = vadd.f32 %v1943_v39, %v1308_v27  ;;  %v1995_v10 = vadd.f32 %v1994_v55, %v1942_v53 }
 0x401   :  { %v1945_v48 = vpop.f32.mrf.mxu0  ;;  %v1996_v63 = vpop.f32.mrf.mxu1 }
 0x402   :  { %v1946_v6 = vadd.f32 %v1945_v48, %v1304_v34  ;;  %v1997_v24 = vadd.f32 %v1996_v63, %v1944_v57 }
 0x403   :  { %v1947_v59 = vpop.f32.mrf.mxu0  ;;  %v1998_v4 = vpop.f32.mrf.mxu1 }
 0x404   :  { %v1948_v20 = vadd.f32 %v1947_v59, %v1308_v27  ;;  %v1999_v32 = vadd.f32 %v1998_v4, %v1946_v6  ;;  %v1312_v4 = vrot.slane %v4416_v46, %v287_v13 }
 0x405   :  { %v2037_v60 = vpop.f32.mrf.mxu0  ;;  %v2000_v17 = vpop.f32.mrf.mxu1 }
 0x406   :  { %v2038_v50 = vadd.f32 %v2037_v60, %v1985_v61  ;;  %v2001_v41 = vadd.f32 %v2000_v17, %v1948_v20 }
 0x407   :  { %v2039_v2 = vpop.f32.mrf.mxu0 }
 0x408   :  { %v2040_v56 = vadd.f32 %v2039_v2, %v1987_v1  ;;  %v2203_v11 = vmax.f32 %v2038_v50, 0.0 }
 0x409   :  { %v2041_v0 = vpop.f32.mrf.mxu0 }
 0x40a   :  { %v2042_v5 = vadd.f32 %v2041_v0, %v1989_v49  ;;  %v2204_v23 = vmax.f32 %v2040_v56, 0.0  ;;  %v2227_v31 = vrot.slane %v2203_v11, 2 }
 0x40b   :  { %v2043_v7 = vpop.f32.mrf.mxu0 }
 0x40c   :  { %v2206_v12 = vmax.f32 %v2042_v5, 0.0  ;;  %v2044_v18 = vadd.f32 %v2043_v7, %v1991_v3  ;;  %v2230_v15 = vrot.slane %v2204_v23, 2 }
 0x40d   :  { %v2047_v33 = vpop.f32.mrf.mxu0 }
 0x40e   :  { %v2228_v26 = vrot.slane %v2206_v12, 2  ;;  %v2207_v29 = vmax.f32 %v2044_v18, 0.0  ;;  %v2048_v30 = vadd.f32 %v2047_v33, %v1995_v10 }
 0x40f   :  { %v2049_v21 = vpop.f32.mrf.mxu0 }
 0x410   :  { %v2231_v36 = vrot.slane %v2207_v29, 2  ;;  %v2209_v37 = vmax.f32 %v2048_v30, 0.0  ;;  %v2050_v40 = vadd.f32 %v2049_v21, %v1997_v24  ;;  %v2229_v43 = vsel %vm164_vm6, %v2227_v31, %v2228_v26 }
 0x411   :  { %v2051_v19 = vpop.f32.mrf.mxu0  ;;  %v4427_v28 = vmax.f32 %v2203_v11, %v2229_v43 }
 0x412   :  { %v2236_v25 = vrot.slane %v2209_v37, 2  ;;  %v2210_v42 = vmax.f32 %v2050_v40, 0.0  ;;  %v2052_v35 = vadd.f32 %v2051_v19, %v1999_v32  ;;  %v2232_v16 = vsel %vm164_vm6, %v2230_v15, %v2231_v36 }
 0x413   :  { %v2053_v44 = vpop.f32.mrf.mxu0  ;;  %v4434_v39 = vmax.f32 %v2204_v23, %v2232_v16 }
 0x414   :  { %v2238_v38 = vrot.slane %v2210_v42, 2  ;;  %v2212_v14 = vmax.f32 %v2052_v35, 0.0  ;;  %v2054_v8 = vadd.f32 %v2053_v44, %v2001_v41  ;;  %v2237_v45 = vsel %vm164_vm6, %v2228_v26, %v2236_v25 }
 0x415   :  { %v4429_v47 = vmax.f32 %v2206_v12, %v2237_v45 }
 0x416   :  { %v2242_v9 = vrot.slane %v2212_v14, 2  ;;  %v2213_v34 = vmax.f32 %v2054_v8, 0.0  ;;  %v2239_v22 = vsel %vm164_vm6, %v2231_v36, %v2238_v38 }
 0x417   :  { %v3651_v27 = vpack.i.bf16 %v4429_v47, %v4427_v28  ;;  %v4436_v48 = vmax.f32 %v2207_v29, %v2239_v22  ;;  %v3308_v54 = vpop.f32.mrf.mxu1 }
 0x418   :  { %v2260_v55 = vsel %vm164_vm6, %v2242_v9, 0.0  ;;  %v2244_v58 = vrot.slane %v2213_v34, 2  ;;  %v2243_v59 = vsel %vm164_vm6, %v2236_v25, %v2242_v9 }
 0x419   :  { %v4440_v52 = vmax.f32 %v2212_v14, %v2260_v55  ;;  %3652 = vrot.lane.b32.xlu1 %v3651_v27, %s3941_s15  ;;  %v3641_v60 = vpack.i.bf16 %v4436_v48, %v4434_v39  ;;  %v4445_v61 = vmax.f32 %v2209_v37, %v2243_v59  ;;  %v3309_v62 = vpop.f32.mrf.mxu1 }
 0x41a   :  { %v2261_v63 = vsel %vm164_vm6, %v2244_v58, 0.0  ;;  %v2245_v1 = vsel %vm164_vm6, %v2238_v38, %v2244_v58  ;;  %v3310_v5 = vadd.f32 %v3309_v62, %v3308_v54 }
 0x41b   :  { %v4449_v2 = vmax.f32 %v2213_v34, %v2261_v63  ;;  %3642 = vrot.lane.b32.xlu0 %v3641_v60, %s3941_s15  ;;  %v3656_v49 = vpack.i.bf16 %v4440_v52, %v4445_v61  ;;  %v4454_v53 = vmax.f32 %v2210_v42, %v2245_v1  ;;  %v3311_v50 = vpop.f32.mrf.mxu1 }
 0x41c   :  { %v2091_v11 = vadd.f32 %v3310_v5, %v1312_v4 }
 0x41d   :  { %3657 = vrot.lane.b32.xlu1 %v3656_v49, %s3941_s15  ;;  %v3646_v56 = vpack.i.bf16 %v4449_v2, %v4454_v53  ;;  %v3312_v0 = vpop.f32.mrf.mxu1 }
 0x41e   :  { %v3313_v12 = vadd.f32 %v3312_v0, %v3311_v50 }
 0x41f   :  { %3647 = vrot.lane.b32.xlu0 %v3646_v56, %s3941_s15  ;;  %v3314_v3 = vpop.f32.mrf.mxu1 }
 0x420   :  { %v2094_v17 = vadd.f32 %v3313_v12, %v1312_v4 }
 0x421   :  { %v3315_v57 = vpop.f32.mrf.mxu1 }
 0x422   :  { %v3316_v26 = vadd.f32 %v3315_v57, %v3314_v3 }
 0x423   :  { %v3317_v6 = vpop.f32.mrf.mxu1 }
 0x424   :  { %v2099_v46 = vadd.f32 %v3316_v26, %v1312_v4 }
 0x425   :  { %v3336_v7 = vpop.f32.mrf.mxu0  ;;  %v3318_v10 = vpop.f32.mrf.mxu1 }
 0x426   :  { %v3319_v36 = vadd.f32 %v3318_v10, %v3317_v6 }
 0x427   :  { %v3337_v18 = vpop.f32.mrf.mxu0  ;;  %v3448_v20 = vpop.f32.mrf.mxu1 }
 0x428   :  { %v3338_v23 = vadd.f32 %v3337_v18, %v3336_v7  ;;  %v2102_v42 = vadd.f32 %v3319_v36, %v1312_v4 }
 0x429   :  { %v3339_v33 = vpop.f32.mrf.mxu0  ;;  %v2188_v24 = vpop.f32.mrf.mxu1 }
 0x42a   :  { %v2140_v29 = vadd.f32 %v3338_v23, %v2091_v11 }
 0x42b   :  { %v3340_v30 = vpop.f32.mrf.mxu0  ;;  %v3449_v32 = vpop.f32.mrf.mxu1 }
 0x42c   :  { %v3341_v21 = vadd.f32 %v3340_v30, %v3339_v33  ;;  %v2189_v51 = vadd.f32 %v2188_v24, %v2140_v29 }
 0x42d   :  { %v3342_v31 = vpop.f32.mrf.mxu0  ;;  %v2191_v13 = vpop.f32.mrf.mxu1 }
 0x42e   :  { %v2205_v37 = vmax.f32 %v2189_v51, 0.0  ;;  %v2143_v40 = vadd.f32 %v3341_v21, %v2094_v17 }
 0x42f   :  { %v3343_v41 = vpop.f32.mrf.mxu0 }
 0x430   :  { %v3344_v15 = vadd.f32 %v3343_v41, %v3342_v31  ;;  %v2192_v19 = vadd.f32 %v2191_v13, %v2143_v40  ;;  %v2233_v43 = vrot.slane %v2205_v37, 2 }
 0x431   :  { %v3345_v25 = vpop.f32.mrf.mxu0 }
 0x432   :  { %v2148_v35 = vadd.f32 %v3344_v15, %v2099_v46  ;;  %v2208_v44 = vmax.f32 %v2192_v19, 0.0 }
 0x433   :  { %v3346_v16 = vpop.f32.mrf.mxu0 }
 0x434   :  { %v2197_v38 = vadd.f32 %v3448_v20, %v2148_v35  ;;  %v3347_v14 = vadd.f32 %v3346_v16, %v3345_v25  ;;  %v2234_v8 = vrot.slane %v2208_v44, 2 }
 0x436   :  { %v2211_v45 = vmax.f32 %v2197_v38, 0.0  ;;  %v2151_v9 = vadd.f32 %v3347_v14, %v2102_v42  ;;  %v2235_v34 = vsel %vm164_vm6, %v2233_v43, %v2234_v8 }
 0x437   :  { %v2265_v54 = vmax.f32 %v2205_v37, %v2235_v34 }
 0x438   :  { %v2200_v22 = vadd.f32 %v3449_v32, %v2151_v9  ;;  %v2240_v27 = vrot.slane %v2211_v45, 2 }
 0x43a   :  { %v2214_v55 = vmax.f32 %v2200_v22, 0.0  ;;  %v2241_v58 = vsel %vm164_vm6, %v2234_v8, %v2240_v27 }
 0x43b   :  { %v2268_v59 = vmax.f32 %v2208_v44, %v2241_v58 }
 0x43c   :  { %v2246_v60 = vrot.slane %v2214_v55, 2 }
 0x43d   :  { %v3661_v62 = vpack.i.bf16 %v2268_v59, %v2265_v54 }
 0x43e   :  { %v2247_v63 = vsel %vm164_vm6, %v2240_v27, %v2246_v60  ;;  %v2262_v1 = vsel %vm164_vm6, %v2246_v60, 0.0 }
 0x43f   :  { %3662 = vrot.lane.b32.xlu0 %v3661_v62, %s3941_s15  ;;  %v2271_v49 = vmax.f32 %v2211_v45, %v2247_v63  ;;  %v2274_v50 = vmax.f32 %v2214_v55, %v2262_v1 }
 0x441   :  { %v3666_v56 = vpack.i.bf16 %v2274_v50, %v2271_v49 }
 0x443   :  { %3667 = vrot.lane.b32.xlu1 %v3666_v56, %s3941_s15 }
 0x48b   :  { %v3653_v23 = vpop.permute.xlu1 %3652 }
 0x48c   :  { %v3655_v19 = vunpack.i.h.bf16 %v3653_v23  ;;  %v3654_v25 = vunpack.i.l.bf16 %v3653_v23 }
 0x48d   :  { %v3643_v0 = vpop.permute.xlu0 %3642 }
 0x48e   :  { %v3645_v3 = vunpack.i.h.bf16 %v3643_v0  ;;  %v3644_v57 = vunpack.i.l.bf16 %v3643_v0  ;;  %v2292_v44 = vmax.f32 %v4429_v47, %v3655_v19  ;;  %v2291_v16 = vmax.f32 %v4427_v28, %v3654_v25 }
 0x48f   :  { %v3658_v33 = vpop.permute.xlu1 %3657 }
 0x490   :  { %v2311_v4 = vmax.f32 %v4434_v39, %v3644_v57  ;;  %v2312_v5 = vmax.f32 %v4436_v48, %v3645_v3  ;;  %v3660_v42 = vunpack.i.h.bf16 %v3658_v33  ;;  %v3659_v35 = vunpack.i.l.bf16 %v3658_v33 }
 0x491   :  { %v3648_v6 = vpop.permute.xlu0 %3647 }
 0x492   :  { %v3650_v7 = vunpack.i.h.bf16 %v3648_v6  ;;  %v3649_v10 = vunpack.i.l.bf16 %v3648_v6  ;;  %v3671_v11 = vpack.i.bf16 %v2312_v5, %v2311_v4  ;;  %v2294_v34 = vmax.f32 %v4440_v52, %v3660_v42 }
 0x493   :  { %v2293_v22 = vmax.f32 %v4445_v61, %v3659_v35 }
 0x494   :  { %v2313_v12 = vmax.f32 %v4454_v53, %v3649_v10  ;;  %v2314_v18 = vmax.f32 %v4449_v2, %v3650_v7  ;;  %3672 = vrot.lane.b32.xlu0 %v3671_v11, %s3941_s15 }
 0x496   :  { %v3676_v20 = vpack.i.bf16 %v2314_v18, %v2313_v12 }
 0x498   :  { %3677 = vrot.lane.b32.xlu1 %v3676_v20, %s3941_s15 }
 0x4b1   :  { %v3663_v24 = vpop.permute.xlu0 %3662 }
 0x4b2   :  { %v3665_v17 = vunpack.i.h.bf16 %v3663_v24  ;;  %v3664_v39 = vunpack.i.l.bf16 %v3663_v24 }
 0x4b4   :  { %v2332_v26 = vmax.f32 %v2268_v59, %v3665_v17  ;;  %v2331_v48 = vmax.f32 %v2265_v54, %v3664_v39 }
 0x4b5   :  { %v3668_v29 = vpop.permute.xlu1 %3667 }
 0x4b6   :  { %v3670_v30 = vunpack.i.h.bf16 %v3668_v29  ;;  %v3669_v32 = vunpack.i.l.bf16 %v3668_v29  ;;  %v2356_v21 = vpack.c.bf16 %v2332_v26, %v2331_v48 }
 0x4b8   :  { %v2334_v51 = vmax.f32 %v2274_v50, %v3670_v30  ;;  %v2333_v53 = vmax.f32 %v2271_v49, %v3669_v32  ;;  %v2377_v2 = vrot.slane %v2356_v21, 4  ;;  %v2366_v46 = vrot.slane %v2356_v21, 2 }
 0x4ba   :  { %v2358_v31 = vpack.c.bf16 %v2334_v51, %v2333_v53 }
 0x4bc   :  { %v2378_v13 = vrot.slane %v2358_v31, 4  ;;  %v2367_v36 = vrot.slane %v2358_v31, 2 }
 0x4be   :  { %v4476_v37 = vsel %vm2373_vm14, %v2377_v2, %v2378_v13  ;;  %v4479_v40 = vsel %vm2373_vm14, %v2378_v13, 0  ;;  %v2368_v41 = vsel %vm164_vm6, %v2366_v46, %v2367_v36  ;;  %v2372_v15 = vsel %vm164_vm6, %v2367_v36, 0 }
 0x4bf   :  { %2391 = vrot.lane.b32.xlu1 %v2368_v41, %s3941_s15 }
 0x4c3   :  { %2395 = vrot.lane.b32.xlu1 %v2372_v15, %s3941_s15 }
 0x506   :  { %v3673_v43 = vpop.permute.xlu0 %3672 }
 0x507   :  { %v3675_v38 = vunpack.i.h.bf16 %v3673_v43  ;;  %v3674_v14 = vunpack.i.l.bf16 %v3673_v43 }
 0x509   :  { %v2351_v8 = vsel %vm181_vm7, %v2291_v16, %v3674_v14  ;;  %v2352_v45 = vsel %vm181_vm7, %v2292_v44, %v3675_v38 }
 0x50a   :  { %v3678_v9 = vpop.permute.xlu1 %3677  ;;  %v4491_v55 = vpack.c.bf16 %v2352_v45, %v2351_v8 }
 0x50b   :  { %v3680_v27 = vunpack.i.h.bf16 %v3678_v9  ;;  %v3679_v54 = vunpack.i.l.bf16 %v3678_v9 }
 0x50c   :  { %v2363_v59 = vrot.slane %v4491_v55, 2  ;;  %v2374_v62 = vrot.slane %v4491_v55, 4 }
 0x50d   :  { %v2353_v58 = vsel %vm181_vm7, %v2293_v22, %v3679_v54  ;;  %v2354_v47 = vsel %vm181_vm7, %v2294_v34, %v3680_v27 }
 0x50e   :  { %v4495_v28 = vpack.c.bf16 %v2354_v47, %v2353_v58 }
 0x510   :  { %v2364_v60 = vrot.slane %v4495_v28, 2  ;;  %v2375_v52 = vrot.slane %v4495_v28, 4 }
 0x512   :  { %v2365_v61 = vsel %vm164_vm6, %v2363_v59, %v2364_v60  ;;  %v2376_v63 = vsel %vm2373_vm14, %v2374_v62, %v2375_v52  ;;  %v2370_v1 = vsel %vm164_vm6, %v2364_v60, 0 }
 0x513   :  { %2389 = vrot.lane.b32.xlu0 %v2365_v61, %s3941_s15 }
 0x517   :  { %2393 = vrot.lane.b32.xlu0 %v2370_v1, %s3941_s15 }
 0x531   :  { %v2392_v49 = vpop.permute.xlu1 %2391 }
 0x535   :  { %v2396_v3 = vpop.permute.xlu1 %2395 }
 0x585   :  { %v2390_v50 = vpop.permute.xlu0 %2389 }
 0x586   :  { %v4509_v56 = vsel %vm181_vm7, %v2390_v50, %v2392_v49  ;;  %v2403_v0 = vsel %vm181_vm7, %v2356_v21, %v2390_v50 }
 0x589   :  { %v2394_v57 = vpop.permute.xlu0 %2393 }
 0x58a   :  { %v4513_v4 = vsel %vm181_vm7, %v2394_v57, %v2396_v3  ;;  %v4516_v5 = vsel %vm181_vm7, %v2358_v31, %v2394_v57 }
 0x58b   :  { %3933 = dma.done.wait [#allocation5 + $0x1], 4608 }
 0x58c   :  { %3934 = vsyncadd [#allocation5 + $0x1], 4294962688  ;;  %2742 = vmatprep.mubr.bf16.mxu0 %v2403_v0  ;;  %2791 = vmatprep.mubr.bf16.mxu1 %v2376_v63  ;;  %v3825_v6 = vld [vmem:[#allocation3 + $0x78] sm:$0xff]   ;;  %v3829_v12 = vld [vmem:[#allocation3 + $0x70] sm:$0xff]  }
 0x58d   :  { %v3826_v7 = vld [vmem:[#allocation3 + $0xf8] sm:$0xff]   ;;  %3354 = vmatprep.subr.bf16.mxu0 %v3825_v6  ;;  %v3830_v18 = vld [vmem:[#allocation3 + $0xf0] sm:$0xff]   ;;  %v3833_v33 = vld [vmem:[#allocation3 + $0x68] sm:$0xff]  }
 0x58e   :  { %v3827_v10 = vld [vmem:[#allocation3 + $0x38] sm:$0xff]   ;;  %3382 = vmatprep.subr.bf16.mxu1 %v3826_v7  ;;  %v3831_v20 = vld [vmem:[#allocation3 + $0x30] sm:$0xff]   ;;  %v3834_v24 = vld [vmem:[#allocation3 + $0xe8] sm:$0xff]  }
 0x58f   :  { %v3828_v11 = vld [vmem:[#allocation3 + $0xb8] sm:$0xff]   ;;  %3355 = vmatpush3.bf16.msra.mxu0 %v3827_v10  ;;  %v3832_v23 = vld [vmem:[#allocation3 + $0xb0] sm:$0xff]   ;;  %v3835_v17 = vld [vmem:[#allocation3 + $0x28] sm:$0xff]  }
 0x590   :  { %3383 = vmatpush3.bf16.msra.mxu1 %v3828_v11  ;;  %3356 = vmatprep.subr.bf16.mxu0 %v3829_v12  ;;  %v3836_v39 = vld [vmem:[#allocation3 + $0xa8] sm:$0xff]   ;;  %v3837_v26 = vld [vmem:[#allocation3 + $0x60] sm:$0xff]   ;;  %v3841_v32 = vld [vmem:[#allocation3 + $0x58] sm:$0xff]  }
 0x591   :  { %3384 = vmatprep.subr.bf16.mxu1 %v3830_v18  ;;  %v3838_v48 = vld [vmem:[#allocation3 + $0xe0] sm:$0xff]   ;;  %v3842_v21 = vld [vmem:[#allocation3 + $0xd8] sm:$0xff]   ;;  %v3845_v31 = vld [vmem:[#allocation3 + $0x50] sm:$0xff]  }
 0x592   :  { %v3839_v29 = vld [vmem:[#allocation3 + $0x20] sm:$0xff]   ;;  %v3843_v51 = vld [vmem:[#allocation3 + $0x18] sm:$0xff]   ;;  %v3846_v2 = vld [vmem:[#allocation3 + $0xd0] sm:$0xff]  }
 0x593   :  { %3357 = vmatpush3.bf16.msra.mxu0 %v3831_v20  ;;  %v3840_v30 = vld [vmem:[#allocation3 + $0xa0] sm:$0xff]   ;;  %v3844_v53 = vld [vmem:[#allocation3 + $0x98] sm:$0xff]   ;;  %v3847_v13 = vld [vmem:[#allocation3 + $0x10] sm:$0xff]  }
 0x594   :  { %3385 = vmatpush3.bf16.msra.mxu1 %v3832_v23  ;;  %3358 = vmatprep.subr.bf16.mxu0 %v3833_v33  ;;  %v3848_v46 = vld [vmem:[#allocation3 + $0x90] sm:$0xff]   ;;  %v3849_v36 = vld [vmem:[#allocation3 + $0x48] sm:$0xff]   ;;  %v3853_v25 = vld [vmem:[#allocation3 + $0x40] sm:$0xff]  }
 0x595   :  { %3386 = vmatprep.subr.bf16.mxu1 %v3834_v24  ;;  %v3850_v41 = vld [vmem:[#allocation3 + $0xc8] sm:$0xff]   ;;  %v3854_v42 = vld [vmem:[#allocation3 + $0xc0] sm:$0xff]   ;;  %v3857_v44 = vld [vmem:[#allocation3 + $0x118] sm:$0xff]  }
 0x596   :  { %v3851_v15 = vld [vmem:[#allocation3 + $0x8] sm:$0xff]   ;;  %v3855_v35 = vld [vmem:[#allocation3] sm:$0xff]   ;;  %v3858_v16 = vld [vmem:[#allocation3 + $0x110] sm:$0xff]  }
 0x597   :  { %3359 = vmatpush3.bf16.msra.mxu0 %v3835_v17  ;;  %v3852_v19 = vld [vmem:[#allocation3 + $0x88] sm:$0xff]   ;;  %v3856_v43 = vld [vmem:[#allocation3 + $0x80] sm:$0xff]  }
 0x598   :  { %3387 = vmatpush3.bf16.msra.mxu1 %v3836_v39  ;;  %3360 = vmatprep.subr.bf16.mxu0 %v3837_v26  ;;  %v3859_v38 = vld [vmem:[#allocation3 + $0x108] sm:$0xff]   ;;  %v3860_v14 = vld [vmem:[#allocation3 + $0x100] sm:$0xff]  }
 0x599   :  { %3388 = vmatprep.subr.bf16.mxu1 %v3838_v48 }
 0x59b   :  { %3361 = vmatpush3.bf16.msra.mxu0 %v3839_v29 }
 0x59c   :  { %3389 = vmatpush3.bf16.msra.mxu1 %v3840_v30  ;;  %3362 = vmatprep.subr.bf16.mxu0 %v3841_v32 }
 0x59d   :  { %3390 = vmatprep.subr.bf16.mxu1 %v3842_v21 }
 0x59f   :  { %3363 = vmatpush3.bf16.msra.mxu0 %v3843_v51 }
 0x5a0   :  { %3391 = vmatpush3.bf16.msra.mxu1 %v3844_v53  ;;  %3364 = vmatprep.subr.bf16.mxu0 %v3845_v31 }
 0x5a1   :  { %3392 = vmatprep.subr.bf16.mxu1 %v3846_v2 }
 0x5a3   :  { %3365 = vmatpush3.bf16.msra.mxu0 %v3847_v13 }
 0x5a4   :  { %3393 = vmatpush3.bf16.msra.mxu1 %v3848_v46  ;;  %3366 = vmatprep.subr.bf16.mxu0 %v3849_v36 }
 0x5a5   :  { %3394 = vmatprep.subr.bf16.mxu1 %v3850_v41 }
 0x5a7   :  { %3367 = vmatpush3.bf16.msra.mxu0 %v3851_v15 }
 0x5a8   :  { %3395 = vmatpush3.bf16.msra.mxu1 %v3852_v19  ;;  %3368 = vmatprep.subr.bf16.mxu0 %v3853_v25 }
 0x5a9   :  { %3396 = vmatprep.subr.bf16.mxu1 %v3854_v42 }
 0x5ab   :  { %3369 = vmatpush3.bf16.msra.mxu0 %v3855_v35 }
 0x5ac   :  { %3397 = vmatpush3.bf16.msra.mxu1 %v3856_v43  ;;  %3450 = vmatprep.subr.bf16.mxu0 %v3857_v44 }
 0x5ae   :  { %2743 = vmatmul.mubr.bf16.vlgmr.msra.gmra.mxu0 %v4491_v55 }
 0x5af   :  { %2792 = vmatmul.mubr.bf16.vlgmr.msra.gmra.mxu1 %v4509_v56  ;;  %3451 = vmatpush3.bf16.msra.mxu0 %v3857_v44 }
 0x5b0   :  { %3452 = vmatprep.subr.bf16.mxu0 %v3858_v16  ;;  %2750 = vmatprep.mubr.bf16.mxu0 %v4516_v5 }
 0x5b1   :  { %3243 = vmatprep.mubr.msk.bf16.mxu1 %vm2373_vm14, %v2375_v52 }
 0x5b3   :  { %3453 = vmatpush3.bf16.msra.mxu0 %v3858_v16 }
 0x5b4   :  { %3454 = vmatprep.subr.bf16.mxu0 %v3859_v38 }
 0x5b6   :  { %2751 = vmatmul.mubr.bf16.gmra.mxu0 %v4495_v28  ;;  %v3206_v28 = vld [vmem:[#allocation6 + $0x2] ss:$0 sm:$0xff] }
 0x5b7   :  { %2800 = vmatmul.mubr.bf16.gmra.mxu1 %v4513_v4  ;;  %3455 = vmatpush3.bf16.msra.mxu0 %v3859_v38 }
 0x5b8   :  { %3456 = vmatprep.subr.bf16.mxu0 %v3860_v14  ;;  %3458 = vmatprep.mubr.msk.bf16.mxu0 %vm181_vm7, %v4476_v37 }
 0x5bb   :  { %3457 = vmatpush3.bf16.msra.mxu0 %v3860_v14 }
 0x5be   :  { %3459 = vmatmul.mubr.msk.bf16.vlgmr.msra.gmra.mxu0 %vm181_vm7, %v4479_v40 }
 0x66e   :  { %v3370_v8 = vpop.f32.mrf.mxu0 }
 0x66f   :  { %v3398_v45 = vpop.f32.mrf.mxu1 }
 0x670   :  { %v3371_v9 = vpop.f32.mrf.mxu0 }
 0x671   :  { %v3399_v34 = vpop.f32.mrf.mxu1  ;;  %v3372_v58 = vadd.f32 %v3371_v9, %v3370_v8 }
 0x672   :  { %v3373_v22 = vpop.f32.mrf.mxu0  ;;  %v3400_v61 = vadd.f32 %v3399_v34, %v3398_v45 }
 0x673   :  { %v3401_v27 = vpop.f32.mrf.mxu1  ;;  %v2745_v37 = vadd.f32 %v3372_v58, %v3206_v28 }
 0x674   :  { %v3374_v54 = vpop.f32.mrf.mxu0 }
 0x675   :  { %v3402_v55 = vpop.f32.mrf.mxu1  ;;  %v3375_v40 = vadd.f32 %v3374_v54, %v3373_v22  ;;  %v2794_v5 = vadd.f32 %v3400_v61, %v2745_v37 }
 0x676   :  { %v3376_v47 = vpop.f32.mrf.mxu0  ;;  %v3403_v18 = vadd.f32 %v3402_v55, %v3401_v27 }
 0x677   :  { %v3404_v59 = vpop.f32.mrf.mxu1  ;;  %v2748_v6 = vadd.f32 %v3375_v40, %v3206_v28 }
 0x678   :  { %v3377_v60 = vpop.f32.mrf.mxu0 }
 0x679   :  { %v3378_v62 = vadd.f32 %v3377_v60, %v3376_v47  ;;  %v3405_v52 = vpop.f32.mrf.mxu1  ;;  %v2797_v26 = vadd.f32 %v3403_v18, %v2748_v6 }
 0x67a   :  { %v3406_v63 = vadd.f32 %v3405_v52, %v3404_v59  ;;  %v3379_v1 = vpop.f32.mrf.mxu0 }
 0x67b   :  { %v2753_v49 = vadd.f32 %v3378_v62, %v3206_v28  ;;  %v3407_v50 = vpop.f32.mrf.mxu1 }
 0x67c   :  { %v3380_v56 = vpop.f32.mrf.mxu0 }
 0x67d   :  { %v3381_v0 = vadd.f32 %v3380_v56, %v3379_v1  ;;  %v3408_v3 = vpop.f32.mrf.mxu1  ;;  %v2802_v57 = vadd.f32 %v3406_v63, %v2753_v49 }
 0x67e   :  { %v3460_v4 = vpop.f32.mrf.mxu0  ;;  %v3409_v10 = vadd.f32 %v3408_v3, %v3407_v50 }
 0x67f   :  { %v2756_v7 = vadd.f32 %v3381_v0, %v3206_v28  ;;  %v2851_v11 = vadd.f32 %v3460_v4, %v2802_v57 }
 0x680   :  { %v2842_v12 = vpop.f32.mrf.mxu0 }
 0x681   :  { %v2859_v20 = vmax.f32 %v2851_v11, 0.0  ;;  %v2843_v23 = vadd.f32 %v2842_v12, %v2794_v5  ;;  %v2805_v33 = vadd.f32 %v3409_v10, %v2756_v7 }
 0x682   :  { %v3461_v24 = vpop.f32.mrf.mxu0 }
 0x683   :  { %v2857_v17 = vmax.f32 %v2843_v23, 0.0  ;;  %v2854_v39 = vadd.f32 %v3461_v24, %v2805_v33 }
 0x684   :  { %v2845_v48 = vpop.f32.mrf.mxu0 }
 0x685   :  { %v2860_v29 = vmax.f32 %v2854_v39, 0.0  ;;  %v2846_v30 = vadd.f32 %v2845_v48, %v2797_v26 }
 0x687   :  { %v2858_v32 = vmax.f32 %v2846_v30, 0.0 }
 0x688   :  { %3935 = dma.done.wait [#allocation5 + $0x2], 1024 }
 0x689   :  { %3936 = vsyncadd [#allocation5 + $0x2], 4294966272  ;;  %v2865_v21 = vpack.c.bf16 %v2858_v32, %v2857_v17  ;;  %v3861_v51 = vld [vmem:[#allocation4 + $0x38] sm:$0xff]   ;;  %v3862_v53 = vld [vmem:[#allocation4 + $0x30] sm:$0xff]   ;;  %v2866_v15 = vpack.c.bf16 %v2860_v29, %v2859_v20 }
 0x68a   :  { %3462 = vmatprep.subr.bf16.mxu1 %v3861_v51  ;;  %v3863_v31 = vld [vmem:[#allocation4 + $0x28] sm:$0xff]   ;;  %v3864_v2 = vld [vmem:[#allocation4 + $0x20] sm:$0xff]   ;;  %v3865_v13 = vld [vmem:[#allocation4 + $0x18] sm:$0xff]  }
 0x68b   :  { %3478 = vmatprep.mubr.bf16.mxu1 %v2865_v21  ;;  %3463 = vmatpush3.bf16.msra.mxu1 %v3861_v51  ;;  %v3866_v46 = vld [vmem:[#allocation4 + $0x10] sm:$0xff]   ;;  %v3867_v36 = vld [vmem:[#allocation4 + $0x8] sm:$0xff]   ;;  %v3868_v41 = vld [vmem:[#allocation4] sm:$0xff]  }
 0x68c   :  { %3464 = vmatprep.subr.bf16.mxu1 %v3862_v53  ;;  %v3246_v19 = vld [vmem:[#allocation6 + $0x3] ss:$0 sm:$0xff] }
 0x68f   :  { %3465 = vmatpush3.bf16.msra.mxu1 %v3862_v53 }
 0x690   :  { %3466 = vmatprep.subr.bf16.mxu1 %v3863_v31 }
 0x693   :  { %3467 = vmatpush3.bf16.msra.mxu1 %v3863_v31 }
 0x694   :  { %3468 = vmatprep.subr.bf16.mxu1 %v3864_v2 }
 0x697   :  { %3469 = vmatpush3.bf16.msra.mxu1 %v3864_v2 }
 0x698   :  { %3470 = vmatprep.subr.bf16.mxu1 %v3865_v13 }
 0x69b   :  { %3471 = vmatpush3.bf16.msra.mxu1 %v3865_v13 }
 0x69c   :  { %3472 = vmatprep.subr.bf16.mxu1 %v3866_v46 }
 0x69f   :  { %3473 = vmatpush3.bf16.msra.mxu1 %v3866_v46 }
 0x6a0   :  { %3474 = vmatprep.subr.bf16.mxu1 %v3867_v36 }
 0x6a3   :  { %3475 = vmatpush3.bf16.msra.mxu1 %v3867_v36 }
 0x6a4   :  { %3476 = vmatprep.subr.bf16.mxu1 %v3868_v41 }
 0x6a7   :  { %3477 = vmatpush3.bf16.msra.mxu1 %v3868_v41 }
 0x6aa   :  { %3479 = vmatmul.mubr.bf16.vlgmr.msra.gmra.mxu1 %v2866_v15 }
 0x76a   :  { %v3480_v25 = vpop.f32.mrf.mxu1 }
 0x76b   :  { %v2979_v42 = vadd.f32 %v3480_v25, %v3246_v19 }
 0x76c   :  { %v2970_v35 = vpop.f32.mrf.mxu1 }
 0x76d   :  { %2987 = vst [vmem:[%s4548_s6 + $0x10] sm:$0xff] %v2979_v42  ;;  %v2971_v43 = vadd.f32 %v3246_v19, %v2970_v35 }
 0x76e   :  { %v3481_v44 = vpop.f32.mrf.mxu1 }
 0x76f   :  { %2985 = vst [vmem:[%s4548_s6] sm:$0xff] %v2971_v43  ;;  %v2982_v16 = vadd.f32 %v3481_v44, %v3246_v19 }
 0x770   :  { %v2973_v38 = vpop.f32.mrf.mxu1 }
 0x771   :  { %2988 = vst [vmem:[%s4548_s6 + $0x18] sm:$0xff] %v2982_v16  ;;  %v2974_v14 = vadd.f32 %v3246_v19, %v2973_v38 }
 0x773   :  { %2986 = vst [vmem:[%s4548_s6 + $0x8] sm:$0xff] %v2974_v14 }
 0x774   :  { %2993 = vsyncpa [#allocation7], 1 }
 0x775   :  { %2994 = vsyncmov [#allocation5] }
 0x778   :  { %s2995_s4 = vpop.sfrf %2994 }
 0x779   :  { %p3255_p1 = scmp.ne.s32.totalorder %s2995_s4, 0 }
 0x77b   :  { %2999 = shalt.err (%p3255_p1)  }
 0x77c   :  { %3001 = vsyncmov [#allocation5 + $0x1] }
 0x77f   :  { %s3002_s18 = vpop.sfrf %3001 }
 0x780   :  { %p3256_p2 = scmp.ne.s32.totalorder %s3002_s18, 0 }
 0x782   :  { %3006 = shalt.err (%p3256_p2)  }
 0x783   :  { %3008 = vsyncmov [#allocation5 + $0x2] }
 0x786   :  { %s3009_s19 = vpop.sfrf %3008 }
 0x787   :  { %p3257_p3 = scmp.ne.s32.totalorder %s3009_s19, 0 }
 0x789   :  { %3013 = shalt.err (%p3257_p3)  }

</bundles_post_ra>
